<compile_context>
chip_gen: v7x
topology: tpu7x:2x2x1
jax: 0.10.0
libtpu: 0.0.40
codegen_flags: <defaults>
</compile_context>

<pallas_src>
import math

import jax
import jax.numpy as jnp
from jax import lax
from jax.experimental import pallas as pl
from jax.experimental.pallas import tpu as pltpu


def bigru_kernel(gi_ref, whh_ref, bhn_ref, outf_ref, outb_ref, h_ref):
    """One grid step = one chunk of TT timesteps, both directions interleaved.

    gi_ref : (2, TT, B, 3H) bf16  precomputed x@W_ih (+ folded r/z biases),
             columns ordered [r | z | n]; direction 1 is time-reversed.
    whh_ref: (2, H, 3H)     bf16  fused recurrent weights [W_hr | W_hz | W_hn].
    bhn_ref: (2, 1, H)      f32   hidden-side bias of the n gate.
    outf_ref: (TT, B, H)    f32   forward hidden states, natural time order.
    outb_ref: (TT, B, H)    f32   backward hidden states, natural time order.
    h_ref  : (2, B, H)      f32   scratch carrying both hidden states across chunks.
    """
    c = pl.program_id(0)
    TT = outf_ref.shape[0]
    H = outf_ref.shape[2]

    @pl.when(c == 0)
    def _():
        h_ref[...] = jnp.zeros_like(h_ref)

    # Loop-invariant loads, hoisted out of the time loop.
    w_f = whh_ref[0]            # (H, 3H) bf16
    w_b = whh_ref[1]
    bn_f = bhn_ref[0]           # (1, H) f32
    bn_b = bhn_ref[1]

    def gru_step(gi, h, w, b_n):
        # gi: (B, 3H) bf16, h: (B, H) f32 -> new h (B, H) f32
        gh = jnp.dot(h.astype(w.dtype), w, preferred_element_type=jnp.float32)
        gi = gi.astype(jnp.float32)
        r = jax.nn.sigmoid(gi[:, 0:H] + gh[:, 0:H])
        z = jax.nn.sigmoid(gi[:, H:2 * H] + gh[:, H:2 * H])
        n = jnp.tanh(gi[:, 2 * H:3 * H] + r * (gh[:, 2 * H:3 * H] + b_n))
        return (1.0 - z) * n + z * h

    def step(j, carry):
        h_f, h_b = carry
        # Two independent dependency chains per step -> MXU latency overlap.
        h_f = gru_step(gi_ref[0, j], h_f, w_f, bn_f)
        h_b = gru_step(gi_ref[1, j], h_b, w_b, bn_b)
        outf_ref[j] = h_f.astype(outf_ref.dtype)
        # Backward stream is time-reversed; row TT-1-j restores natural order
        # within this block (block index handled by the out_spec index_map).
        outb_ref[TT - 1 - j] = h_b.astype(outb_ref.dtype)
        return h_f, h_b

    unroll = True if TT <= 8 else 8
    h_f, h_b = lax.fori_loop(0, TT, step, (h_ref[0], h_ref[1]), unroll=unroll)
    h_ref[0] = h_f
    h_ref[1] = h_b


def _round_up(x, m):
    return ((x + m - 1) // m) * m


def _pick_time_chunk(T, B, H, gi_itemsize, budget_bytes=12 * 1024 * 1024, cap=64):
    """Largest TT whose double-buffered gi/out blocks fit a conservative VMEM
    budget (safe under the default scoped limit on v5e/v6e/v7x).  Prefers a
    divisor of T (no padding); otherwise returns the cap and the wrapper pads T."""
    per_t = 2 * (2 * B * 3 * H * gi_itemsize) + 2 * (2 * B * H * 4)
    tt_max = int(max(1, min(cap, budget_bytes // per_t, T)))
    best = 1
    for cand in range(1, tt_max + 1):
        if T % cand == 0:
            best = cand
    if best >= min(8, tt_max):
        return best
    return tt_max


def bigru_forward(x, params, time_chunk=None, compute_dtype=jnp.bfloat16):
    """x: (B, T, n_in) float32. Returns (B, T, 2*H) float32."""
    B, T, n_in = x.shape
    wih, whh = params["wih"], params["whh"]     # (2,3,n_in,H), (2,3,H,H)
    bih, bhh = params["bih"], params["bhh"]     # (2,3,H),      (2,3,H)
    H = whh.shape[-1]

    gi_itemsize = jnp.dtype(compute_dtype).itemsize
    B_pad = _round_up(B, 8)
    TT = _pick_time_chunk(T, B_pad, H, gi_itemsize) if time_chunk is None else time_chunk
    T_pad = _round_up(T, TT)
    nc = T_pad // TT

    if B_pad != B:
        x = jnp.pad(x, ((0, B_pad - B), (0, 0), (0, 0)))

    xt = jnp.transpose(x, (1, 0, 2))                       # time-major (T, B_pad, n_in)
    x_dirs = jnp.stack([xt, xt[::-1]], axis=0)             # (2, T, B_pad, n_in)
    if T_pad != T:
        # Pad at the END of both streams: padded steps run after all real
        # timesteps in each direction, so real outputs are unaffected.
        x_dirs = jnp.pad(x_dirs, ((0, 0), (0, T_pad - T), (0, 0), (0, 0)))

    # Fused, gate-concatenated weights: columns ordered [r | z | n].
    wih_cat = jnp.transpose(wih, (0, 2, 1, 3)).reshape(2, n_in, 3 * H)
    whh_cat = jnp.transpose(whh, (0, 2, 1, 3)).reshape(2, H, 3 * H).astype(compute_dtype)

    # Hoisted input projection for all timesteps & both directions (one big
    # matmul), with b_ir+b_hr and b_iz+b_hz folded in.  b_hn stays separate.
    bias_fold = bih.at[:, :2, :].add(bhh[:, :2, :]).reshape(2, 3 * H)
    gi = jnp.einsum("dtbi,dik->dtbk", x_dirs, wih_cat) + bias_fold[:, None, None, :]
    gi = gi.astype(compute_dtype)                          # (2, T_pad, B_pad, 3H)
    bhn = bhh[:, 2, :][:, None, :]                         # (2, 1, H) f32

    out_f, out_b = pl.pallas_call(
        bigru_kernel,
        grid=(nc,),
        in_specs=[
            pl.BlockSpec((2, TT, B_pad, 3 * H), lambda c: (0, c, 0, 0)),
            pl.BlockSpec((2, H, 3 * H), lambda c: (0, 0, 0)),
            pl.BlockSpec((2, 1, H), lambda c: (0, 0, 0)),
        ],
        out_specs=[
            # Forward writes time-chunk c; backward (time-reversed stream)
            # chunk c holds original time-chunk nc-1-c.
            pl.BlockSpec((TT, B_pad, H), lambda c: (c, 0, 0)),
            pl.BlockSpec((TT, B_pad, H), lambda c: (nc - 1 - c, 0, 0)),
        ],
        out_shape=[
            jax.ShapeDtypeStruct((T_pad, B_pad, H), jnp.float32),
            jax.ShapeDtypeStruct((T_pad, B_pad, H), jnp.float32),
        ],
        scratch_shapes=[pltpu.VMEM((2, B_pad, H), jnp.float32)],
        compiler_params=pltpu.CompilerParams(
            dimension_semantics=("arbitrary",)),
    )(gi, whh_cat, bhn)

    # Forward valid rows: [0, T).  Backward valid rows: [T_pad-T, T_pad)
    # (padded backward steps land in discarded leading rows).
    yf = out_f[:T, :B]                                      # (T, B, H)
    yb = out_b[T_pad - T:, :B]                              # (T, B, H)
    y = jnp.concatenate([yf, yb], axis=-1)                  # (T, B, 2H)
    return jnp.transpose(y, (1, 0, 2))                      # (B, T, 2H)


def init_params(key, n_in, n_hidden):
    """PyTorch nn.GRU init: U(-1/sqrt(H), 1/sqrt(H)).  Layout:
    wih (2,3,n_in,H), whh (2,3,H,H), bih (2,3,H), bhh (2,3,H);
    dim0 = direction [fwd, bwd], dim1 = gate [r, z, n]; weights stored
    transposed so the kernel/reference compute x @ W."""
    k = 1.0 / math.sqrt(n_hidden)
    keys = jax.random.split(key, 4)
    u = lambda kk, shape: jax.random.uniform(kk, shape, jnp.float32, -k, k)
    return {
        "wih": u(keys[0], (2, 3, n_in, n_hidden)),
        "whh": u(keys[1], (2, 3, n_hidden, n_hidden)),
        "bih": u(keys[2], (2, 3, n_hidden)),
        "bhh": u(keys[3], (2, 3, n_hidden)),
    }


def bigru_reference(x, params):
    """Pure-JAX f32 reference (lax.scan) mirroring the PyTorch GRU cell exactly."""
    wih, whh, bih, bhh = params["wih"], params["whh"], params["bih"], params["bhh"]
    H = whh.shape[-1]
    xt = jnp.transpose(x, (1, 0, 2))

    def run_dir(xs, d):
        def cell(h, x_t):
            gi_r = x_t @ wih[d, 0] + bih[d, 0]
            gi_z = x_t @ wih[d, 1] + bih[d, 1]
            gi_n = x_t @ wih[d, 2] + bih[d, 2]
            gh_r = h @ whh[d, 0] + bhh[d, 0]
            gh_z = h @ whh[d, 1] + bhh[d, 1]
            gh_n = h @ whh[d, 2] + bhh[d, 2]
            r = jax.nn.sigmoid(gi_r + gh_r)
            z = jax.nn.sigmoid(gi_z + gh_z)
            n = jnp.tanh(gi_n + r * gh_n)
            h_new = (1.0 - z) * n + z * h
            return h_new, h_new

        h0 = jnp.zeros((xs.shape[1], H), jnp.float32)
        _, ys = lax.scan(cell, h0, xs)
        return ys

    yf = run_dir(xt, 0)
    yb = run_dir(xt[::-1], 1)[::-1]
    return jnp.transpose(jnp.concatenate([yf, yb], axis=-1), (1, 0, 2))


# TODO(synk): num_layers > 1 stacking and inter-layer dropout are not implemented
# (the module's defaults num_layers=1, dropout=0 are fully covered).

if __name__ == "__main__":
    B, T, N_IN, HIDDEN = 2, 8, 16, 32

    key = jax.random.PRNGKey(0)
    kx, kp = jax.random.split(key)
    x = jax.random.normal(kx, (B, T, N_IN), jnp.float32)
    params = init_params(kp, N_IN, HIDDEN)

    # time_chunk=4 -> grid of 2 chunks: exercises the hidden-state carry across
    # chunks as well as the chunked-time / interleaved-direction fast path.
    out = bigru_forward(x, params, time_chunk=4)
    out = jax.block_until_ready(out)
    assert out.shape == (B, T, 2 * HIDDEN), out.shape

    ref = jax.block_until_ready(bigru_reference(x, params))
    # bf16 gi / W_hh (f32 carry & accumulation) -> looser tolerance vs f32 ref.
    assert jnp.allclose(out, ref, atol=3e-2, rtol=3e-2), \
        float(jnp.max(jnp.abs(out - ref)))

    print("KERNEL_OK")
</pallas_src>

<mosaic_0001>
module attributes {stable_mosaic.version = 11 : i64} {
  func.func @bigru_kernel(%arg0: i32, %arg1: memref<2x4x8x96xbf16, #tpu.memory_space<vmem>>, %arg2: memref<2x32x96xbf16, #tpu.memory_space<vmem>>, %arg3: memref<2x1x32xf32, #tpu.memory_space<vmem>>, %arg4: memref<4x8x32xf32, #tpu.memory_space<vmem>>, %arg5: memref<4x8x32xf32, #tpu.memory_space<vmem>>, %arg6: memref<2x8x32xf32, #tpu.memory_space<vmem>>) attributes {dimension_semantics = [#tpu.dimension_semantics<arbitrary>], iteration_bounds = array<i64: 2>, scalar_prefetch = 0 : i64, scratch_operands = 1 : i64, tpu.core_type = #tpu.core_type<tc>, window_params = [{transform_indices = @transform_0, window_bounds = array<i64: 2, 4, 8, 96>}, {pipeline_mode = #tpu.pipeline_mode<synchronous>, transform_indices = @transform_1, window_bounds = array<i64: 2, 32, 96>}, {pipeline_mode = #tpu.pipeline_mode<synchronous>, transform_indices = @transform_2, window_bounds = array<i64: 2, 1, 32>}, {transform_indices = @transform_3, window_bounds = array<i64: 4, 8, 32>}, {transform_indices = @transform_4, window_bounds = array<i64: 4, 8, 32>}]} {
    %c0_i32 = arith.constant 0 : i32
    %0 = arith.cmpi eq, %arg0, %c0_i32 : i32
    %1 = arith.extui %0 : i1 to i32
    %c0_i32_0 = arith.constant 0 : i32
    %2 = arith.cmpi ne, %1, %c0_i32_0 : i32
    scf.if %2 {
      %cst_99 = arith.constant 0.000000e+00 : f32
      %329 = vector.broadcast %cst_99 : f32 to vector<2x8x32xf32>
      %c0_100 = arith.constant 0 : index
      %c0_101 = arith.constant 0 : index
      %c0_102 = arith.constant 0 : index
      %330 = vector.load %arg6[%c0_100, %c0_101, %c0_102] : memref<2x8x32xf32, #tpu.memory_space<vmem>>, vector<2x8x32xf32>
      tpu.vector_store %arg6[%c0_100, %c0_101, %c0_102], %329 {strides = array<i32>} : memref<2x8x32xf32, #tpu.memory_space<vmem>>, vector<2x8x32xf32>,
    } else {
    }
    %c0 = arith.constant 0 : index
    %c0_1 = arith.constant 0 : index
    %c0_2 = arith.constant 0 : index
    %3 = vector.load %arg2[%c0, %c0_1, %c0_2] : memref<2x32x96xbf16, #tpu.memory_space<vmem>>, vector<1x32x96xbf16>
    %4 = vector.shape_cast %3 : vector<1x32x96xbf16> to vector<32x96xbf16>
    %c1 = arith.constant 1 : index
    %c0_3 = arith.constant 0 : index
    %c0_4 = arith.constant 0 : index
    %5 = vector.load %arg2[%c1, %c0_3, %c0_4] : memref<2x32x96xbf16, #tpu.memory_space<vmem>>, vector<1x32x96xbf16>
    %6 = vector.shape_cast %5 : vector<1x32x96xbf16> to vector<32x96xbf16>
    %c0_5 = arith.constant 0 : index
    %c0_6 = arith.constant 0 : index
    %c0_7 = arith.constant 0 : index
    %7 = vector.load %arg3[%c0_5, %c0_6, %c0_7] : memref<2x1x32xf32, #tpu.memory_space<vmem>>, vector<1x1x32xf32>
    %8 = vector.shape_cast %7 : vector<1x1x32xf32> to vector<1x32xf32>
    %c1_8 = arith.constant 1 : index
    %c0_9 = arith.constant 0 : index
    %c0_10 = arith.constant 0 : index
    %9 = vector.load %arg3[%c1_8, %c0_9, %c0_10] : memref<2x1x32xf32, #tpu.memory_space<vmem>>, vector<1x1x32xf32>
    %10 = vector.shape_cast %9 : vector<1x1x32xf32> to vector<1x32xf32>
    %c0_11 = arith.constant 0 : index
    %c0_12 = arith.constant 0 : index
    %c0_13 = arith.constant 0 : index
    %11 = vector.load %arg6[%c0_11, %c0_12, %c0_13] : memref<2x8x32xf32, #tpu.memory_space<vmem>>, vector<1x8x32xf32>
    %12 = vector.shape_cast %11 : vector<1x8x32xf32> to vector<8x32xf32>
    %c1_14 = arith.constant 1 : index
    %c0_15 = arith.constant 0 : index
    %c0_16 = arith.constant 0 : index
    %13 = vector.load %arg6[%c1_14, %c0_15, %c0_16] : memref<2x8x32xf32, #tpu.memory_space<vmem>>, vector<1x8x32xf32>
    %14 = vector.shape_cast %13 : vector<1x8x32xf32> to vector<8x32xf32>
    %c0_i32_17 = arith.constant 0 : i32
    %c0_18 = arith.constant 0 : index
    %15 = arith.index_cast %c0_i32_17 : i32 to index
    %c0_19 = arith.constant 0 : index
    %c0_20 = arith.constant 0 : index
    %16 = vector.load %arg1[%c0_18, %15, %c0_19, %c0_20] : memref<2x4x8x96xbf16, #tpu.memory_space<vmem>>, vector<1x1x8x96xbf16>
    %17 = vector.shape_cast %16 : vector<1x1x8x96xbf16> to vector<8x96xbf16>
    %18 = arith.truncf %12 : vector<8x32xf32> to vector<8x32xbf16>
    %cst = arith.constant dense<0.000000e+00> : vector<8x96xf32>
    %19 = tpu.matmul %18, %4, %cst {dimension_numbers = #tpu.dot_dimension_numbers<[1], [0], [0], [1], [0, 0, 1, 1], [], []>} : vector<8x32xbf16>, vector<32x96xbf16>, vector<8x96xf32> -> vector<8x96xf32>
    %20 = arith.extf %17 : vector<8x96xbf16> to vector<8x96xf32>
    %21 = vector.extract_strided_slice %20 {offsets = [0, 0], sizes = [8, 32], strides = [1, 1]} : vector<8x96xf32> to vector<8x32xf32>
    %22 = vector.extract_strided_slice %19 {offsets = [0, 0], sizes = [8, 32], strides = [1, 1]} : vector<8x96xf32> to vector<8x32xf32>
    %23 = arith.addf %21, %22 : vector<8x32xf32>
    %24 = arith.negf %23 : vector<8x32xf32>
    %25 = math.exp %24 : vector<8x32xf32>
    %cst_21 = arith.constant 1.000000e+00 : f32
    %26 = vector.broadcast %cst_21 : f32 to vector<8x32xf32>
    %27 = arith.addf %26, %25 : vector<8x32xf32>
    %28 = arith.divf %26, %27 : vector<8x32xf32>
    %29 = vector.extract_strided_slice %20 {offsets = [0, 32], sizes = [8, 32], strides = [1, 1]} : vector<8x96xf32> to vector<8x32xf32>
    %30 = vector.extract_strided_slice %19 {offsets = [0, 32], sizes = [8, 32], strides = [1, 1]} : vector<8x96xf32> to vector<8x32xf32>
    %31 = arith.addf %29, %30 : vector<8x32xf32>
    %32 = arith.negf %31 : vector<8x32xf32>
    %33 = math.exp %32 : vector<8x32xf32>
    %cst_22 = arith.constant 1.000000e+00 : f32
    %34 = vector.broadcast %cst_22 : f32 to vector<8x32xf32>
    %35 = arith.addf %34, %33 : vector<8x32xf32>
    %36 = arith.divf %34, %35 : vector<8x32xf32>
    %37 = vector.extract_strided_slice %20 {offsets = [0, 64], sizes = [8, 32], strides = [1, 1]} : vector<8x96xf32> to vector<8x32xf32>
    %38 = vector.extract_strided_slice %19 {offsets = [0, 64], sizes = [8, 32], strides = [1, 1]} : vector<8x96xf32> to vector<8x32xf32>
    %39 = vector.broadcast %8 : vector<1x32xf32> to vector<8x32xf32>
    %40 = arith.addf %38, %39 : vector<8x32xf32>
    %41 = arith.mulf %28, %40 : vector<8x32xf32>
    %42 = arith.addf %37, %41 : vector<8x32xf32>
    %43 = math.tanh %42 : vector<8x32xf32>
    %cst_23 = arith.constant 1.000000e+00 : f32
    %44 = vector.broadcast %cst_23 : f32 to vector<8x32xf32>
    %45 = arith.subf %44, %36 : vector<8x32xf32>
    %46 = arith.mulf %45, %43 : vector<8x32xf32>
    %47 = arith.mulf %36, %12 : vector<8x32xf32>
    %48 = arith.addf %46, %47 : vector<8x32xf32>
    %c1_24 = arith.constant 1 : index
    %49 = arith.index_cast %c0_i32_17 : i32 to index
    %c0_25 = arith.constant 0 : index
    %c0_26 = arith.constant 0 : index
    %50 = vector.load %arg1[%c1_24, %49, %c0_25, %c0_26] : memref<2x4x8x96xbf16, #tpu.memory_space<vmem>>, vector<1x1x8x96xbf16>
    %51 = vector.shape_cast %50 : vector<1x1x8x96xbf16> to vector<8x96xbf16>
    %52 = arith.truncf %14 : vector<8x32xf32> to vector<8x32xbf16>
    %cst_27 = arith.constant dense<0.000000e+00> : vector<8x96xf32>
    %53 = tpu.matmul %52, %6, %cst_27 {dimension_numbers = #tpu.dot_dimension_numbers<[1], [0], [0], [1], [0, 0, 1, 1], [], []>} : vector<8x32xbf16>, vector<32x96xbf16>, vector<8x96xf32> -> vector<8x96xf32>
    %54 = arith.extf %51 : vector<8x96xbf16> to vector<8x96xf32>
    %55 = vector.extract_strided_slice %54 {offsets = [0, 0], sizes = [8, 32], strides = [1, 1]} : vector<8x96xf32> to vector<8x32xf32>
    %56 = vector.extract_strided_slice %53 {offsets = [0, 0], sizes = [8, 32], strides = [1, 1]} : vector<8x96xf32> to vector<8x32xf32>
    %57 = arith.addf %55, %56 : vector<8x32xf32>
    %58 = arith.negf %57 : vector<8x32xf32>
    %59 = math.exp %58 : vector<8x32xf32>
    %cst_28 = arith.constant 1.000000e+00 : f32
    %60 = vector.broadcast %cst_28 : f32 to vector<8x32xf32>
    %61 = arith.addf %60, %59 : vector<8x32xf32>
    %62 = arith.divf %60, %61 : vector<8x32xf32>
    %63 = vector.extract_strided_slice %54 {offsets = [0, 32], sizes = [8, 32], strides = [1, 1]} : vector<8x96xf32> to vector<8x32xf32>
    %64 = vector.extract_strided_slice %53 {offsets = [0, 32], sizes = [8, 32], strides = [1, 1]} : vector<8x96xf32> to vector<8x32xf32>
    %65 = arith.addf %63, %64 : vector<8x32xf32>
    %66 = arith.negf %65 : vector<8x32xf32>
    %67 = math.exp %66 : vector<8x32xf32>
    %cst_29 = arith.constant 1.000000e+00 : f32
    %68 = vector.broadcast %cst_29 : f32 to vector<8x32xf32>
    %69 = arith.addf %68, %67 : vector<8x32xf32>
    %70 = arith.divf %68, %69 : vector<8x32xf32>
    %71 = vector.extract_strided_slice %54 {offsets = [0, 64], sizes = [8, 32], strides = [1, 1]} : vector<8x96xf32> to vector<8x32xf32>
    %72 = vector.extract_strided_slice %53 {offsets = [0, 64], sizes = [8, 32], strides = [1, 1]} : vector<8x96xf32> to vector<8x32xf32>
    %73 = vector.broadcast %10 : vector<1x32xf32> to vector<8x32xf32>
    %74 = arith.addf %72, %73 : vector<8x32xf32>
    %75 = arith.mulf %62, %74 : vector<8x32xf32>
    %76 = arith.addf %71, %75 : vector<8x32xf32>
    %77 = math.tanh %76 : vector<8x32xf32>
    %cst_30 = arith.constant 1.000000e+00 : f32
    %78 = vector.broadcast %cst_30 : f32 to vector<8x32xf32>
    %79 = arith.subf %78, %70 : vector<8x32xf32>
    %80 = arith.mulf %79, %77 : vector<8x32xf32>
    %81 = arith.mulf %70, %14 : vector<8x32xf32>
    %82 = arith.addf %80, %81 : vector<8x32xf32>
    %83 = arith.index_cast %c0_i32_17 : i32 to index
    %c0_31 = arith.constant 0 : index
    %c0_32 = arith.constant 0 : index
    %84 = vector.load %arg4[%83, %c0_31, %c0_32] : memref<4x8x32xf32, #tpu.memory_space<vmem>>, vector<1x8x32xf32>
    %85 = vector.shape_cast %84 : vector<1x8x32xf32> to vector<8x32xf32>
    %86 = vector.shape_cast %48 : vector<8x32xf32> to vector<1x8x32xf32>
    tpu.vector_store %arg4[%83, %c0_31, %c0_32], %86 {strides = array<i32>} : memref<4x8x32xf32, #tpu.memory_space<vmem>>, vector<1x8x32xf32>,
    %c3_i32 = arith.constant 3 : i32
    %87 = arith.subi %c3_i32, %c0_i32_17 : i32
    %88 = arith.index_cast %87 : i32 to index
    %c0_33 = arith.constant 0 : index
    %c0_34 = arith.constant 0 : index
    %89 = vector.load %arg5[%88, %c0_33, %c0_34] : memref<4x8x32xf32, #tpu.memory_space<vmem>>, vector<1x8x32xf32>
    %90 = vector.shape_cast %89 : vector<1x8x32xf32> to vector<8x32xf32>
    %91 = vector.shape_cast %82 : vector<8x32xf32> to vector<1x8x32xf32>
    tpu.vector_store %arg5[%88, %c0_33, %c0_34], %91 {strides = array<i32>} : memref<4x8x32xf32, #tpu.memory_space<vmem>>, vector<1x8x32xf32>,
    %c1_i32 = arith.constant 1 : i32
    %c0_35 = arith.constant 0 : index
    %92 = arith.index_cast %c1_i32 : i32 to index
    %c0_36 = arith.constant 0 : index
    %c0_37 = arith.constant 0 : index
    %93 = vector.load %arg1[%c0_35, %92, %c0_36, %c0_37] : memref<2x4x8x96xbf16, #tpu.memory_space<vmem>>, vector<1x1x8x96xbf16>
    %94 = vector.shape_cast %93 : vector<1x1x8x96xbf16> to vector<8x96xbf16>
    %95 = arith.truncf %48 : vector<8x32xf32> to vector<8x32xbf16>
    %cst_38 = arith.constant dense<0.000000e+00> : vector<8x96xf32>
    %96 = tpu.matmul %95, %4, %cst_38 {dimension_numbers = #tpu.dot_dimension_numbers<[1], [0], [0], [1], [0, 0, 1, 1], [], []>} : vector<8x32xbf16>, vector<32x96xbf16>, vector<8x96xf32> -> vector<8x96xf32>
    %97 = arith.extf %94 : vector<8x96xbf16> to vector<8x96xf32>
    %98 = vector.extract_strided_slice %97 {offsets = [0, 0], sizes = [8, 32], strides = [1, 1]} : vector<8x96xf32> to vector<8x32xf32>
    %99 = vector.extract_strided_slice %96 {offsets = [0, 0], sizes = [8, 32], strides = [1, 1]} : vector<8x96xf32> to vector<8x32xf32>
    %100 = arith.addf %98, %99 : vector<8x32xf32>
    %101 = arith.negf %100 : vector<8x32xf32>
    %102 = math.exp %101 : vector<8x32xf32>
    %cst_39 = arith.constant 1.000000e+00 : f32
    %103 = vector.broadcast %cst_39 : f32 to vector<8x32xf32>
    %104 = arith.addf %103, %102 : vector<8x32xf32>
    %105 = arith.divf %103, %104 : vector<8x32xf32>
    %106 = vector.extract_strided_slice %97 {offsets = [0, 32], sizes = [8, 32], strides = [1, 1]} : vector<8x96xf32> to vector<8x32xf32>
    %107 = vector.extract_strided_slice %96 {offsets = [0, 32], sizes = [8, 32], strides = [1, 1]} : vector<8x96xf32> to vector<8x32xf32>
    %108 = arith.addf %106, %107 : vector<8x32xf32>
    %109 = arith.negf %108 : vector<8x32xf32>
    %110 = math.exp %109 : vector<8x32xf32>
    %cst_40 = arith.constant 1.000000e+00 : f32
    %111 = vector.broadcast %cst_40 : f32 to vector<8x32xf32>
    %112 = arith.addf %111, %110 : vector<8x32xf32>
    %113 = arith.divf %111, %112 : vector<8x32xf32>
    %114 = vector.extract_strided_slice %97 {offsets = [0, 64], sizes = [8, 32], strides = [1, 1]} : vector<8x96xf32> to vector<8x32xf32>
    %115 = vector.extract_strided_slice %96 {offsets = [0, 64], sizes = [8, 32], strides = [1, 1]} : vector<8x96xf32> to vector<8x32xf32>
    %116 = vector.broadcast %8 : vector<1x32xf32> to vector<8x32xf32>
    %117 = arith.addf %115, %116 : vector<8x32xf32>
    %118 = arith.mulf %105, %117 : vector<8x32xf32>
    %119 = arith.addf %114, %118 : vector<8x32xf32>
    %120 = math.tanh %119 : vector<8x32xf32>
    %cst_41 = arith.constant 1.000000e+00 : f32
    %121 = vector.broadcast %cst_41 : f32 to vector<8x32xf32>
    %122 = arith.subf %121, %113 : vector<8x32xf32>
    %123 = arith.mulf %122, %120 : vector<8x32xf32>
    %124 = arith.mulf %113, %48 : vector<8x32xf32>
    %125 = arith.addf %123, %124 : vector<8x32xf32>
    %c1_42 = arith.constant 1 : index
    %126 = arith.index_cast %c1_i32 : i32 to index
    %c0_43 = arith.constant 0 : index
    %c0_44 = arith.constant 0 : index
    %127 = vector.load %arg1[%c1_42, %126, %c0_43, %c0_44] : memref<2x4x8x96xbf16, #tpu.memory_space<vmem>>, vector<1x1x8x96xbf16>
    %128 = vector.shape_cast %127 : vector<1x1x8x96xbf16> to vector<8x96xbf16>
    %129 = arith.truncf %82 : vector<8x32xf32> to vector<8x32xbf16>
    %cst_45 = arith.constant dense<0.000000e+00> : vector<8x96xf32>
    %130 = tpu.matmul %129, %6, %cst_45 {dimension_numbers = #tpu.dot_dimension_numbers<[1], [0], [0], [1], [0, 0, 1, 1], [], []>} : vector<8x32xbf16>, vector<32x96xbf16>, vector<8x96xf32> -> vector<8x96xf32>
    %131 = arith.extf %128 : vector<8x96xbf16> to vector<8x96xf32>
    %132 = vector.extract_strided_slice %131 {offsets = [0, 0], sizes = [8, 32], strides = [1, 1]} : vector<8x96xf32> to vector<8x32xf32>
    %133 = vector.extract_strided_slice %130 {offsets = [0, 0], sizes = [8, 32], strides = [1, 1]} : vector<8x96xf32> to vector<8x32xf32>
    %134 = arith.addf %132, %133 : vector<8x32xf32>
    %135 = arith.negf %134 : vector<8x32xf32>
    %136 = math.exp %135 : vector<8x32xf32>
    %cst_46 = arith.constant 1.000000e+00 : f32
    %137 = vector.broadcast %cst_46 : f32 to vector<8x32xf32>
    %138 = arith.addf %137, %136 : vector<8x32xf32>
    %139 = arith.divf %137, %138 : vector<8x32xf32>
    %140 = vector.extract_strided_slice %131 {offsets = [0, 32], sizes = [8, 32], strides = [1, 1]} : vector<8x96xf32> to vector<8x32xf32>
    %141 = vector.extract_strided_slice %130 {offsets = [0, 32], sizes = [8, 32], strides = [1, 1]} : vector<8x96xf32> to vector<8x32xf32>
    %142 = arith.addf %140, %141 : vector<8x32xf32>
    %143 = arith.negf %142 : vector<8x32xf32>
    %144 = math.exp %143 : vector<8x32xf32>
    %cst_47 = arith.constant 1.000000e+00 : f32
    %145 = vector.broadcast %cst_47 : f32 to vector<8x32xf32>
    %146 = arith.addf %145, %144 : vector<8x32xf32>
    %147 = arith.divf %145, %146 : vector<8x32xf32>
    %148 = vector.extract_strided_slice %131 {offsets = [0, 64], sizes = [8, 32], strides = [1, 1]} : vector<8x96xf32> to vector<8x32xf32>
    %149 = vector.extract_strided_slice %130 {offsets = [0, 64], sizes = [8, 32], strides = [1, 1]} : vector<8x96xf32> to vector<8x32xf32>
    %150 = vector.broadcast %10 : vector<1x32xf32> to vector<8x32xf32>
    %151 = arith.addf %149, %150 : vector<8x32xf32>
    %152 = arith.mulf %139, %151 : vector<8x32xf32>
    %153 = arith.addf %148, %152 : vector<8x32xf32>
    %154 = math.tanh %153 : vector<8x32xf32>
    %cst_48 = arith.constant 1.000000e+00 : f32
    %155 = vector.broadcast %cst_48 : f32 to vector<8x32xf32>
    %156 = arith.subf %155, %147 : vector<8x32xf32>
    %157 = arith.mulf %156, %154 : vector<8x32xf32>
    %158 = arith.mulf %147, %82 : vector<8x32xf32>
    %159 = arith.addf %157, %158 : vector<8x32xf32>
    %160 = arith.index_cast %c1_i32 : i32 to index
    %c0_49 = arith.constant 0 : index
    %c0_50 = arith.constant 0 : index
    %161 = vector.load %arg4[%160, %c0_49, %c0_50] : memref<4x8x32xf32, #tpu.memory_space<vmem>>, vector<1x8x32xf32>
    %162 = vector.shape_cast %161 : vector<1x8x32xf32> to vector<8x32xf32>
    %163 = vector.shape_cast %125 : vector<8x32xf32> to vector<1x8x32xf32>
    tpu.vector_store %arg4[%160, %c0_49, %c0_50], %163 {strides = array<i32>} : memref<4x8x32xf32, #tpu.memory_space<vmem>>, vector<1x8x32xf32>,
    %c3_i32_51 = arith.constant 3 : i32
    %164 = arith.subi %c3_i32_51, %c1_i32 : i32
    %165 = arith.index_cast %164 : i32 to index
    %c0_52 = arith.constant 0 : index
    %c0_53 = arith.constant 0 : index
    %166 = vector.load %arg5[%165, %c0_52, %c0_53] : memref<4x8x32xf32, #tpu.memory_space<vmem>>, vector<1x8x32xf32>
    %167 = vector.shape_cast %166 : vector<1x8x32xf32> to vector<8x32xf32>
    %168 = vector.shape_cast %159 : vector<8x32xf32> to vector<1x8x32xf32>
    tpu.vector_store %arg5[%165, %c0_52, %c0_53], %168 {strides = array<i32>} : memref<4x8x32xf32, #tpu.memory_space<vmem>>, vector<1x8x32xf32>,
    %c2_i32 = arith.constant 2 : i32
    %c0_54 = arith.constant 0 : index
    %169 = arith.index_cast %c2_i32 : i32 to index
    %c0_55 = arith.constant 0 : index
    %c0_56 = arith.constant 0 : index
    %170 = vector.load %arg1[%c0_54, %169, %c0_55, %c0_56] : memref<2x4x8x96xbf16, #tpu.memory_space<vmem>>, vector<1x1x8x96xbf16>
    %171 = vector.shape_cast %170 : vector<1x1x8x96xbf16> to vector<8x96xbf16>
    %172 = arith.truncf %125 : vector<8x32xf32> to vector<8x32xbf16>
    %cst_57 = arith.constant dense<0.000000e+00> : vector<8x96xf32>
    %173 = tpu.matmul %172, %4, %cst_57 {dimension_numbers = #tpu.dot_dimension_numbers<[1], [0], [0], [1], [0, 0, 1, 1], [], []>} : vector<8x32xbf16>, vector<32x96xbf16>, vector<8x96xf32> -> vector<8x96xf32>
    %174 = arith.extf %171 : vector<8x96xbf16> to vector<8x96xf32>
    %175 = vector.extract_strided_slice %174 {offsets = [0, 0], sizes = [8, 32], strides = [1, 1]} : vector<8x96xf32> to vector<8x32xf32>
    %176 = vector.extract_strided_slice %173 {offsets = [0, 0], sizes = [8, 32], strides = [1, 1]} : vector<8x96xf32> to vector<8x32xf32>
    %177 = arith.addf %175, %176 : vector<8x32xf32>
    %178 = arith.negf %177 : vector<8x32xf32>
    %179 = math.exp %178 : vector<8x32xf32>
    %cst_58 = arith.constant 1.000000e+00 : f32
    %180 = vector.broadcast %cst_58 : f32 to vector<8x32xf32>
    %181 = arith.addf %180, %179 : vector<8x32xf32>
    %182 = arith.divf %180, %181 : vector<8x32xf32>
    %183 = vector.extract_strided_slice %174 {offsets = [0, 32], sizes = [8, 32], strides = [1, 1]} : vector<8x96xf32> to vector<8x32xf32>
    %184 = vector.extract_strided_slice %173 {offsets = [0, 32], sizes = [8, 32], strides = [1, 1]} : vector<8x96xf32> to vector<8x32xf32>
    %185 = arith.addf %183, %184 : vector<8x32xf32>
    %186 = arith.negf %185 : vector<8x32xf32>
    %187 = math.exp %186 : vector<8x32xf32>
    %cst_59 = arith.constant 1.000000e+00 : f32
    %188 = vector.broadcast %cst_59 : f32 to vector<8x32xf32>
    %189 = arith.addf %188, %187 : vector<8x32xf32>
    %190 = arith.divf %188, %189 : vector<8x32xf32>
    %191 = vector.extract_strided_slice %174 {offsets = [0, 64], sizes = [8, 32], strides = [1, 1]} : vector<8x96xf32> to vector<8x32xf32>
    %192 = vector.extract_strided_slice %173 {offsets = [0, 64], sizes = [8, 32], strides = [1, 1]} : vector<8x96xf32> to vector<8x32xf32>
    %193 = vector.broadcast %8 : vector<1x32xf32> to vector<8x32xf32>
    %194 = arith.addf %192, %193 : vector<8x32xf32>
    %195 = arith.mulf %182, %194 : vector<8x32xf32>
    %196 = arith.addf %191, %195 : vector<8x32xf32>
    %197 = math.tanh %196 : vector<8x32xf32>
    %cst_60 = arith.constant 1.000000e+00 : f32
    %198 = vector.broadcast %cst_60 : f32 to vector<8x32xf32>
    %199 = arith.subf %198, %190 : vector<8x32xf32>
    %200 = arith.mulf %199, %197 : vector<8x32xf32>
    %201 = arith.mulf %190, %125 : vector<8x32xf32>
    %202 = arith.addf %200, %201 : vector<8x32xf32>
    %c1_61 = arith.constant 1 : index
    %203 = arith.index_cast %c2_i32 : i32 to index
    %c0_62 = arith.constant 0 : index
    %c0_63 = arith.constant 0 : index
    %204 = vector.load %arg1[%c1_61, %203, %c0_62, %c0_63] : memref<2x4x8x96xbf16, #tpu.memory_space<vmem>>, vector<1x1x8x96xbf16>
    %205 = vector.shape_cast %204 : vector<1x1x8x96xbf16> to vector<8x96xbf16>
    %206 = arith.truncf %159 : vector<8x32xf32> to vector<8x32xbf16>
    %cst_64 = arith.constant dense<0.000000e+00> : vector<8x96xf32>
    %207 = tpu.matmul %206, %6, %cst_64 {dimension_numbers = #tpu.dot_dimension_numbers<[1], [0], [0], [1], [0, 0, 1, 1], [], []>} : vector<8x32xbf16>, vector<32x96xbf16>, vector<8x96xf32> -> vector<8x96xf32>
    %208 = arith.extf %205 : vector<8x96xbf16> to vector<8x96xf32>
    %209 = vector.extract_strided_slice %208 {offsets = [0, 0], sizes = [8, 32], strides = [1, 1]} : vector<8x96xf32> to vector<8x32xf32>
    %210 = vector.extract_strided_slice %207 {offsets = [0, 0], sizes = [8, 32], strides = [1, 1]} : vector<8x96xf32> to vector<8x32xf32>
    %211 = arith.addf %209, %210 : vector<8x32xf32>
    %212 = arith.negf %211 : vector<8x32xf32>
    %213 = math.exp %212 : vector<8x32xf32>
    %cst_65 = arith.constant 1.000000e+00 : f32
    %214 = vector.broadcast %cst_65 : f32 to vector<8x32xf32>
    %215 = arith.addf %214, %213 : vector<8x32xf32>
    %216 = arith.divf %214, %215 : vector<8x32xf32>
    %217 = vector.extract_strided_slice %208 {offsets = [0, 32], sizes = [8, 32], strides = [1, 1]} : vector<8x96xf32> to vector<8x32xf32>
    %218 = vector.extract_strided_slice %207 {offsets = [0, 32], sizes = [8, 32], strides = [1, 1]} : vector<8x96xf32> to vector<8x32xf32>
    %219 = arith.addf %217, %218 : vector<8x32xf32>
    %220 = arith.negf %219 : vector<8x32xf32>
    %221 = math.exp %220 : vector<8x32xf32>
    %cst_66 = arith.constant 1.000000e+00 : f32
    %222 = vector.broadcast %cst_66 : f32 to vector<8x32xf32>
    %223 = arith.addf %222, %221 : vector<8x32xf32>
    %224 = arith.divf %222, %223 : vector<8x32xf32>
    %225 = vector.extract_strided_slice %208 {offsets = [0, 64], sizes = [8, 32], strides = [1, 1]} : vector<8x96xf32> to vector<8x32xf32>
    %226 = vector.extract_strided_slice %207 {offsets = [0, 64], sizes = [8, 32], strides = [1, 1]} : vector<8x96xf32> to vector<8x32xf32>
    %227 = vector.broadcast %10 : vector<1x32xf32> to vector<8x32xf32>
    %228 = arith.addf %226, %227 : vector<8x32xf32>
    %229 = arith.mulf %216, %228 : vector<8x32xf32>
    %230 = arith.addf %225, %229 : vector<8x32xf32>
    %231 = math.tanh %230 : vector<8x32xf32>
    %cst_67 = arith.constant 1.000000e+00 : f32
    %232 = vector.broadcast %cst_67 : f32 to vector<8x32xf32>
    %233 = arith.subf %232, %224 : vector<8x32xf32>
    %234 = arith.mulf %233, %231 : vector<8x32xf32>
    %235 = arith.mulf %224, %159 : vector<8x32xf32>
    %236 = arith.addf %234, %235 : vector<8x32xf32>
    %237 = arith.index_cast %c2_i32 : i32 to index
    %c0_68 = arith.constant 0 : index
    %c0_69 = arith.constant 0 : index
    %238 = vector.load %arg4[%237, %c0_68, %c0_69] : memref<4x8x32xf32, #tpu.memory_space<vmem>>, vector<1x8x32xf32>
    %239 = vector.shape_cast %238 : vector<1x8x32xf32> to vector<8x32xf32>
    %240 = vector.shape_cast %202 : vector<8x32xf32> to vector<1x8x32xf32>
    tpu.vector_store %arg4[%237, %c0_68, %c0_69], %240 {strides = array<i32>} : memref<4x8x32xf32, #tpu.memory_space<vmem>>, vector<1x8x32xf32>,
    %c3_i32_70 = arith.constant 3 : i32
    %241 = arith.subi %c3_i32_70, %c2_i32 : i32
    %242 = arith.index_cast %241 : i32 to index
    %c0_71 = arith.constant 0 : index
    %c0_72 = arith.constant 0 : index
    %243 = vector.load %arg5[%242, %c0_71, %c0_72] : memref<4x8x32xf32, #tpu.memory_space<vmem>>, vector<1x8x32xf32>
    %244 = vector.shape_cast %243 : vector<1x8x32xf32> to vector<8x32xf32>
    %245 = vector.shape_cast %236 : vector<8x32xf32> to vector<1x8x32xf32>
    tpu.vector_store %arg5[%242, %c0_71, %c0_72], %245 {strides = array<i32>} : memref<4x8x32xf32, #tpu.memory_space<vmem>>, vector<1x8x32xf32>,
    %c3_i32_73 = arith.constant 3 : i32
    %c0_74 = arith.constant 0 : index
    %246 = arith.index_cast %c3_i32_73 : i32 to index
    %c0_75 = arith.constant 0 : index
    %c0_76 = arith.constant 0 : index
    %247 = vector.load %arg1[%c0_74, %246, %c0_75, %c0_76] : memref<2x4x8x96xbf16, #tpu.memory_space<vmem>>, vector<1x1x8x96xbf16>
    %248 = vector.shape_cast %247 : vector<1x1x8x96xbf16> to vector<8x96xbf16>
    %249 = arith.truncf %202 : vector<8x32xf32> to vector<8x32xbf16>
    %cst_77 = arith.constant dense<0.000000e+00> : vector<8x96xf32>
    %250 = tpu.matmul %249, %4, %cst_77 {dimension_numbers = #tpu.dot_dimension_numbers<[1], [0], [0], [1], [0, 0, 1, 1], [], []>} : vector<8x32xbf16>, vector<32x96xbf16>, vector<8x96xf32> -> vector<8x96xf32>
    %251 = arith.extf %248 : vector<8x96xbf16> to vector<8x96xf32>
    %252 = vector.extract_strided_slice %251 {offsets = [0, 0], sizes = [8, 32], strides = [1, 1]} : vector<8x96xf32> to vector<8x32xf32>
    %253 = vector.extract_strided_slice %250 {offsets = [0, 0], sizes = [8, 32], strides = [1, 1]} : vector<8x96xf32> to vector<8x32xf32>
    %254 = arith.addf %252, %253 : vector<8x32xf32>
    %255 = arith.negf %254 : vector<8x32xf32>
    %256 = math.exp %255 : vector<8x32xf32>
    %cst_78 = arith.constant 1.000000e+00 : f32
    %257 = vector.broadcast %cst_78 : f32 to vector<8x32xf32>
    %258 = arith.addf %257, %256 : vector<8x32xf32>
    %259 = arith.divf %257, %258 : vector<8x32xf32>
    %260 = vector.extract_strided_slice %251 {offsets = [0, 32], sizes = [8, 32], strides = [1, 1]} : vector<8x96xf32> to vector<8x32xf32>
    %261 = vector.extract_strided_slice %250 {offsets = [0, 32], sizes = [8, 32], strides = [1, 1]} : vector<8x96xf32> to vector<8x32xf32>
    %262 = arith.addf %260, %261 : vector<8x32xf32>
    %263 = arith.negf %262 : vector<8x32xf32>
    %264 = math.exp %263 : vector<8x32xf32>
    %cst_79 = arith.constant 1.000000e+00 : f32
    %265 = vector.broadcast %cst_79 : f32 to vector<8x32xf32>
    %266 = arith.addf %265, %264 : vector<8x32xf32>
    %267 = arith.divf %265, %266 : vector<8x32xf32>
    %268 = vector.extract_strided_slice %251 {offsets = [0, 64], sizes = [8, 32], strides = [1, 1]} : vector<8x96xf32> to vector<8x32xf32>
    %269 = vector.extract_strided_slice %250 {offsets = [0, 64], sizes = [8, 32], strides = [1, 1]} : vector<8x96xf32> to vector<8x32xf32>
    %270 = vector.broadcast %8 : vector<1x32xf32> to vector<8x32xf32>
    %271 = arith.addf %269, %270 : vector<8x32xf32>
    %272 = arith.mulf %259, %271 : vector<8x32xf32>
    %273 = arith.addf %268, %272 : vector<8x32xf32>
    %274 = math.tanh %273 : vector<8x32xf32>
    %cst_80 = arith.constant 1.000000e+00 : f32
    %275 = vector.broadcast %cst_80 : f32 to vector<8x32xf32>
    %276 = arith.subf %275, %267 : vector<8x32xf32>
    %277 = arith.mulf %276, %274 : vector<8x32xf32>
    %278 = arith.mulf %267, %202 : vector<8x32xf32>
    %279 = arith.addf %277, %278 : vector<8x32xf32>
    %c1_81 = arith.constant 1 : index
    %280 = arith.index_cast %c3_i32_73 : i32 to index
    %c0_82 = arith.constant 0 : index
    %c0_83 = arith.constant 0 : index
    %281 = vector.load %arg1[%c1_81, %280, %c0_82, %c0_83] : memref<2x4x8x96xbf16, #tpu.memory_space<vmem>>, vector<1x1x8x96xbf16>
    %282 = vector.shape_cast %281 : vector<1x1x8x96xbf16> to vector<8x96xbf16>
    %283 = arith.truncf %236 : vector<8x32xf32> to vector<8x32xbf16>
    %cst_84 = arith.constant dense<0.000000e+00> : vector<8x96xf32>
    %284 = tpu.matmul %283, %6, %cst_84 {dimension_numbers = #tpu.dot_dimension_numbers<[1], [0], [0], [1], [0, 0, 1, 1], [], []>} : vector<8x32xbf16>, vector<32x96xbf16>, vector<8x96xf32> -> vector<8x96xf32>
    %285 = arith.extf %282 : vector<8x96xbf16> to vector<8x96xf32>
    %286 = vector.extract_strided_slice %285 {offsets = [0, 0], sizes = [8, 32], strides = [1, 1]} : vector<8x96xf32> to vector<8x32xf32>
    %287 = vector.extract_strided_slice %284 {offsets = [0, 0], sizes = [8, 32], strides = [1, 1]} : vector<8x96xf32> to vector<8x32xf32>
    %288 = arith.addf %286, %287 : vector<8x32xf32>
    %289 = arith.negf %288 : vector<8x32xf32>
    %290 = math.exp %289 : vector<8x32xf32>
    %cst_85 = arith.constant 1.000000e+00 : f32
    %291 = vector.broadcast %cst_85 : f32 to vector<8x32xf32>
    %292 = arith.addf %291, %290 : vector<8x32xf32>
    %293 = arith.divf %291, %292 : vector<8x32xf32>
    %294 = vector.extract_strided_slice %285 {offsets = [0, 32], sizes = [8, 32], strides = [1, 1]} : vector<8x96xf32> to vector<8x32xf32>
    %295 = vector.extract_strided_slice %284 {offsets = [0, 32], sizes = [8, 32], strides = [1, 1]} : vector<8x96xf32> to vector<8x32xf32>
    %296 = arith.addf %294, %295 : vector<8x32xf32>
    %297 = arith.negf %296 : vector<8x32xf32>
    %298 = math.exp %297 : vector<8x32xf32>
    %cst_86 = arith.constant 1.000000e+00 : f32
    %299 = vector.broadcast %cst_86 : f32 to vector<8x32xf32>
    %300 = arith.addf %299, %298 : vector<8x32xf32>
    %301 = arith.divf %299, %300 : vector<8x32xf32>
    %302 = vector.extract_strided_slice %285 {offsets = [0, 64], sizes = [8, 32], strides = [1, 1]} : vector<8x96xf32> to vector<8x32xf32>
    %303 = vector.extract_strided_slice %284 {offsets = [0, 64], sizes = [8, 32], strides = [1, 1]} : vector<8x96xf32> to vector<8x32xf32>
    %304 = vector.broadcast %10 : vector<1x32xf32> to vector<8x32xf32>
    %305 = arith.addf %303, %304 : vector<8x32xf32>
    %306 = arith.mulf %293, %305 : vector<8x32xf32>
    %307 = arith.addf %302, %306 : vector<8x32xf32>
    %308 = math.tanh %307 : vector<8x32xf32>
    %cst_87 = arith.constant 1.000000e+00 : f32
    %309 = vector.broadcast %cst_87 : f32 to vector<8x32xf32>
    %310 = arith.subf %309, %301 : vector<8x32xf32>
    %311 = arith.mulf %310, %308 : vector<8x32xf32>
    %312 = arith.mulf %301, %236 : vector<8x32xf32>
    %313 = arith.addf %311, %312 : vector<8x32xf32>
    %314 = arith.index_cast %c3_i32_73 : i32 to index
    %c0_88 = arith.constant 0 : index
    %c0_89 = arith.constant 0 : index
    %315 = vector.load %arg4[%314, %c0_88, %c0_89] : memref<4x8x32xf32, #tpu.memory_space<vmem>>, vector<1x8x32xf32>
    %316 = vector.shape_cast %315 : vector<1x8x32xf32> to vector<8x32xf32>
    %317 = vector.shape_cast %279 : vector<8x32xf32> to vector<1x8x32xf32>
    tpu.vector_store %arg4[%314, %c0_88, %c0_89], %317 {strides = array<i32>} : memref<4x8x32xf32, #tpu.memory_space<vmem>>, vector<1x8x32xf32>,
    %c3_i32_90 = arith.constant 3 : i32
    %318 = arith.subi %c3_i32_90, %c3_i32_73 : i32
    %319 = arith.index_cast %318 : i32 to index
    %c0_91 = arith.constant 0 : index
    %c0_92 = arith.constant 0 : index
    %320 = vector.load %arg5[%319, %c0_91, %c0_92] : memref<4x8x32xf32, #tpu.memory_space<vmem>>, vector<1x8x32xf32>
    %321 = vector.shape_cast %320 : vector<1x8x32xf32> to vector<8x32xf32>
    %322 = vector.shape_cast %313 : vector<8x32xf32> to vector<1x8x32xf32>
    tpu.vector_store %arg5[%319, %c0_91, %c0_92], %322 {strides = array<i32>} : memref<4x8x32xf32, #tpu.memory_space<vmem>>, vector<1x8x32xf32>,
    %c4_i32 = arith.constant 4 : i32
    %c0_93 = arith.constant 0 : index
    %c0_94 = arith.constant 0 : index
    %c0_95 = arith.constant 0 : index
    %323 = vector.load %arg6[%c0_93, %c0_94, %c0_95] : memref<2x8x32xf32, #tpu.memory_space<vmem>>, vector<1x8x32xf32>
    %324 = vector.shape_cast %323 : vector<1x8x32xf32> to vector<8x32xf32>
    %325 = vector.shape_cast %279 : vector<8x32xf32> to vector<1x8x32xf32>
    tpu.vector_store %arg6[%c0_93, %c0_94, %c0_95], %325 {strides = array<i32>} : memref<2x8x32xf32, #tpu.memory_space<vmem>>, vector<1x8x32xf32>,
    %c1_96 = arith.constant 1 : index
    %c0_97 = arith.constant 0 : index
    %c0_98 = arith.constant 0 : index
    %326 = vector.load %arg6[%c1_96, %c0_97, %c0_98] : memref<2x8x32xf32, #tpu.memory_space<vmem>>, vector<1x8x32xf32>
    %327 = vector.shape_cast %326 : vector<1x8x32xf32> to vector<8x32xf32>
    %328 = vector.shape_cast %313 : vector<8x32xf32> to vector<1x8x32xf32>
    tpu.vector_store %arg6[%c1_96, %c0_97, %c0_98], %328 {strides = array<i32>} : memref<2x8x32xf32, #tpu.memory_space<vmem>>, vector<1x8x32xf32>,
    return
  }
  func.func @transform_0(%arg0: i32) -> (i32, i32, i32, i32) {
    %c0_i32 = arith.constant 0 : i32
    %c0_i32_0 = arith.constant 0 : i32
    %c0_i32_1 = arith.constant 0 : i32
    %c0_i32_2 = arith.constant 0 : i32
    return %c0_i32, %arg0, %c0_i32_0, %c0_i32_1 : i32, i32, i32, i32
  }
  func.func @transform_1(%arg0: i32) -> (i32, i32, i32) {
    %c0_i32 = arith.constant 0 : i32
    %c0_i32_0 = arith.constant 0 : i32
    %c0_i32_1 = arith.constant 0 : i32
    %c0_i32_2 = arith.constant 0 : i32
    return %c0_i32, %c0_i32_0, %c0_i32_1 : i32, i32, i32
  }
  func.func @transform_2(%arg0: i32) -> (i32, i32, i32) {
    %c0_i32 = arith.constant 0 : i32
    %c0_i32_0 = arith.constant 0 : i32
    %c0_i32_1 = arith.constant 0 : i32
    %c0_i32_2 = arith.constant 0 : i32
    return %c0_i32, %c0_i32_0, %c0_i32_1 : i32, i32, i32
  }
  func.func @transform_3(%arg0: i32) -> (i32, i32, i32) {
    %c0_i32 = arith.constant 0 : i32
    %c0_i32_0 = arith.constant 0 : i32
    %c0_i32_1 = arith.constant 0 : i32
    return %arg0, %c0_i32, %c0_i32_0 : i32, i32, i32
  }
  func.func @transform_4(%arg0: i32) -> (i32, i32, i32) {
    %c1_i32 = arith.constant 1 : i32
    %0 = arith.subi %c1_i32, %arg0 : i32
    %c0_i32 = arith.constant 0 : i32
    %c0_i32_0 = arith.constant 0 : i32
    %c0_i32_1 = arith.constant 0 : i32
    return %0, %c0_i32, %c0_i32_0 : i32, i32, i32
  }
}

</mosaic_0001>

<bundles_post_ra>
// kernel: tpu_custom_call.1
= control target key start
LH: loop header
LB: loop body
LE: loop exit
PB: predicated region body
PF: predicated region fallthrough
CT: control target
= control target key end

     0   :  { %s2158_s0 = inlined_call_operand.hbm [shape: bf16[2,8,8,96], index: 0, kind: input, shape index: {}]   ;;  %s2159_s1 = inlined_call_operand.hbm [shape: bf16[2,32,96], index: 1, kind: input, shape index: {}]   ;;  %s2160_s2 = inlined_call_operand.vmem [shape: f32[2,1,32], index: 2, kind: input, shape index: {}]   ;;  %s2161_s3 = inlined_call_operand.hbm [shape: f32[8,8,32], index: 3, kind: output, shape index: {0}]   ;;  %s2162_s4 = inlined_call_operand.hbm [shape: f32[8,8,32], index: 4, kind: output, shape index: {1}]  }
   0x1   :  { %2173 = sst [smem:[#allocation23_spill]] %s2159_s1 }
   0x2   :  { %10 = vsyncpa [#allocation4], 0 }
   0x3   :  { %12 = vsyncpa [#allocation4 + $0x1], 0 }
   0x4   :  { %13 = vsyncpa [#allocation7], 0 }
   0x5   :  { %14 = vsyncpa [#allocation5], 0 }
   0x6   :  { %16 = vsyncpa [#allocation5 + $0x1], 0 }
   0x7   :  { %17 = vsyncpa [#allocation10], 0 }
   0x8   :  { %19 = vsyncpa [#allocation10 + $0x1], 0  ;;  %s1657_s15 = smov 0   ;;  %s1659_s16 = smov 0  }
   0x9   :  { %s1661_s17 = smov 0   ;;  %s1663_s18 = smov 0  }
   0xa   :  { %s1665_s19 = smov 0   ;;  %s1667_s20 = smov 0  }
   0xb   :  { %s1669_s21 = smov 0  }
   0xc LB: > { %2174 = sst [smem:[#allocation18_spill]] %s1596_s17  ;;  %s1693_s22 = sadd.s32 4294967295, %s1612_s21   ;;  %s1612_s21 = sphi %s1669_s21, %s2200_s21   ;;  %s1608_s20 = sphi %s1667_s20, %s2204_s20   ;;  %s1604_s19 = sphi %s1665_s19, %s2208_s19   ;;  %s1600_s18 = sphi %s1663_s18, %s2207_s18   ;;  %s1596_s17 = sphi %s1661_s17, %s2202_s17   ;;  %s1592_s16 = sphi %s1659_s16, %s2206_s16   ;;  %s1588_s15 = sphi %s1657_s15, %s2205_s15  }
   0xd   : > { %2175 = sst [smem:[#allocation19_spill]] %s1608_s20  ;;  %s1153_s23 = sadd.s32 4294967294, %s1612_s21  }
   0xe   : > { %s1697_s24 = sadd.s32 1, %s1612_s21   ;;  %s32_s25 = sadd.s32 1, %s1608_s20 }
   0xf   : > { %2176 = sst [smem:[#allocation20_spill]] %s1697_s24  ;;  %s29_s26 = ssub.s32 %s1612_s21, %s1697_s24 }
  0x10   : > { %p39_p0 = scmp.ne.s32.totalorder %s1608_s20, %s1604_s19  ;;  %p30_p1 = scmp.eq.s32.totalorder %s29_s26, 0 }
  0x11   : > { %p40_p2 = scmp.eq.s32.totalorder %s1612_s21, 0  ;;  %p45_p3 = scmp.ne.s32.totalorder %s1604_s19, %s1600_s18 }
  0x12   : > { %p2163_p4 = scmp.eq.s32.totalorder %s1693_s22, 0  ;;  %p111_p7 = scmp.eq.s32.totalorder %s1693_s22, 1 }
  0x13   : > { %s1709_s27 = scalar_select %p30_p1, %s1608_s20, %s32_s25  }
  0x14   : > { %p1711_p5 = por %p40_p2, %p39_p0  ;;  %p1717_p6 = por %p2163_p4, %p45_p3 }
  0x15   : > { %2177 = sst [smem:[#allocation21_spill]] %s1709_s27  ;;  %p1722_p8 = scmp.eq.s32.totalorder %s1153_s23, 1 }
  0x16   : > { %s2178_s28 = scalar_select %p1711_p5, 1, 0 }
  0x17   : > { %s2179_s29 = scalar_select %p1717_p6, 1, 0 }
  0x18   : > { %s123_s5 = ssub.s32 1, %s1612_s21  ;;  %s124_s6 = ssub.s32 1, %s1697_s24 }
  0x19   : > { %p1730_p9 = por %p111_p7, %p39_p0  ;;  %p1736_p10 = por %p1722_p8, %p45_p3 }
  0x1a   : > { %s125_s9 = ssub.s32 %s123_s5, %s124_s6  ;;  %s128_s10 = sadd.s32 1, %s1596_s17 }
  0x1b   : > { %s2181_s7 = scalar_select %p1730_p9, 1, 0 }
  0x1c   : > { %s2182_s8 = scalar_select %p1736_p10, 1, 0 }
  0x1d   : > { %p126_p11 = scmp.eq.s32.totalorder %s125_s9, 0  ;;  %p138_p12 = scmp.ne.s32.totalorder %s1596_s17, %s1592_s16 }
  0x1e   : > { %p144_p13 = scmp.ne.s32.totalorder %s1592_s16, %s1588_s15  ;;  %p1154_p1 = scmp.ge.s32.totalorder %s1612_s21, 1 }
  0x1f   : > { %s1747_s11 = scalar_select %p126_p11, %s1596_s17, %s128_s10  }
  0x20   : > { %p1751_p2 = por %p138_p12, %p111_p7  ;;  %p1757_p0 = por %p144_p13, %p1722_p8 }
  0x21   : > { %2183 = sst [smem:[#allocation22_spill]] %s1747_s11  ;;  %p152_p3 = scmp.lt.s32.totalorder %s1612_s21, 3 }
  0x22   : > { %s2184_s12 = scalar_select %p1751_p2, 1, 0 }
  0x23   : > { %s2185_s13 = scalar_select %p1757_p0, 1, 0 }
  0x24   : > { %p1763_p10 = pnand %p1154_p1, %p152_p3  ;;  %s1614_s23 = smov [#allocation6]  }
  0x25   : > { %s164_s25 = sshll.u32 %s1614_s23, 4  ;;  %p2187_p7 = scmp.eq.s32.totalorder %s1693_s22, 0  ;;  %s165_s25 = int_to_ptr.vmem [resolvable:$true] %s164_s25 }
  0x26   : > { %s2186_s14 = scalar_select %p1763_p10, 1, 0 }
  0x27   : > { %p1320_p11 = pneg %p1763_p10  ;;  %s2189_s1 = sld [smem:[#allocation23_spill]] }
  0x29   : > { %p1771_p12 = pnand %p1320_p11, %p2187_p7 }
  0x2b   : > { %p1460_p13 = pneg %p1771_p12 }
  0x2d   : > { %s1458_s6 = scalar_lea.hbm %s2189_s1, 512 }
  0x2e   : > { %p1459_p8 = scmp.ne.s32.totalorder %s2189_s1, %s1458_s6  ;;  %p1465_p11 = scmp.lt.u32.totalorder %s1458_s6, %s2189_s1 }
  0x30   : > { %p1461_p1 = pnand %p1460_p13, %p1459_p8 }
  0x32   : > { %p1462_p3 = pneg %p1461_p1 }
  0x34   : > { %p1467_p7 = pnand %p1465_p11, %p1462_p3 }
  0x36   : > { %1470 = shalt.err (!%p1467_p7)
}
  0x37   : > { %s1471_s11 = scalar_lea.vmem %s165_s25, 512  ;;  %p1479_p9 = scmp.lt.s32.totalorder %s165_s25, %s165_s25 }
  0x38   : > { %p1472_p4 = scmp.ne.s32.totalorder %s165_s25, %s1471_s11  ;;  %p1480_p6 = scmp.lt.s32.totalorder %s1471_s11, %s1471_s11 }
  0x3a   : > { %p1474_p0 = pnand %p1472_p4, %p1460_p13  ;;  %p1481_p10 = por %p1480_p6, %p1479_p9 }
  0x3c   : > { %p1475_p2 = pneg %p1474_p0 }
  0x3e   : > { %p1482_p5 = pnand %p1481_p10, %p1475_p2 }
  0x40   : > { %1485 = shalt.err (!%p1482_p5)
}
  0x41   : > { %s1615_s30 = smov 64   ;;  %s1616_s5 = smov 4  }
  0x42   : > { %1323 = dma.hbm_to_vmem [thread:$0]  (!%p1771_p12), %s2189_s1, 512, %s165_s25, [#allocation7], %s1615_s30, %s1615_s30, %s1616_s5  }
  0x43   : > { %p1156_p8 = scmp.ge.s32.totalorder %s1612_s21, 2 }
  0x45   : > { %177 = sbr.rel (%p1156_p8) target bundleno = 90 (0x5a), region = 24 }
  0x4c   : > { %s181_s27 = sand.u32 1, %s1608_s20   ;;  %s1212_s26 = sshll.u32 %s1612_s21, 8 }
  0x4d   : > { %s1157_s11 = sshll.u32 %s181_s27, 5  ;;  %p2190_p4 = scmp.ne.s32.totalorder %s2178_s28, 0 }
  0x4e   : > { %s191_s30 = scalar_lea.hbm %s2158_s0, %s1212_s26  ;;  %s185_s9 = scalar_lea.vmem [#allocation3], %s1157_s11 }
  0x4f   : > { %s1305_s6 = scalar_select %p2190_p4, [#allocation0], [#allocation13] }
  0x50   : > { %s204_s10 = sshll.u32 %s185_s9, 4  ;;  %s1617_s1 = smov 512   ;;  %s205_s10 = int_to_ptr.vmem [resolvable:$true] %s204_s10 }
  0x51   : > { %s196_s5 = sld [smem:[%s1305_s6]]   ;;  %s1618_s17 = smov 256  }
  0x52   : > { %1306 = sst [smem:[#allocation12]] (%p2190_p4), %s1617_s1  ;;  %s1619_s20 = smov 4  }
  0x53   : > { %1307 = sst [smem:[#allocation12 + $0x1]] (%p2190_p4), %s1618_s17  ;;  %s1620_s24 = smov 64  }
  0x54   : > { %1308 = sst [smem:[#allocation12 + $0x2]] (%p2190_p4), %s1619_s20  ;;  %s182_s6 = scalar_lea.sflag [#allocation4], %s181_s27 }
  0x55   : > { %1309 = sst [smem:[#allocation12 + $0x3]] (%p2190_p4), %s1620_s24  ;;  %s1621_s23 = smov [#allocation11]  }
  0x56   : > { %1310 = sst [smem:[#allocation12 + $0x4]] (%p2190_p4), %s1620_s24 }
  0x57   : > { %s1160_s26 = sshll.u32 %s196_s5, 26  ;;  %1311 = sst [smem:[#allocation12 + $0x5]] (%p2190_p4), %s1619_s20 }
  0x58   : > { %s1161_s11 = sadd.s32 134217728, %s1160_s26 }
  0x59   : > { %1312 = dma.general (%p2190_p4), %s191_s30, 512, %s205_s10, %s182_s6, %s1621_s23, [#allocation12], %s1161_s11, 0  }
  0x5a PF: > { %p2191_p5 = scmp.ne.s32.totalorder %s2186_s14, 0 }
  0x5b   : > { %s1818_s1 = sand.u32 (!%p2191_p5), 1, %s1604_s19   ;;  %p2192_p6 = scmp.ne.s32.totalorder (!%p2191_p5), %s2179_s29, 0 }
  0x5c   : > { %229 = sbr.rel (%p2191_p5) target bundleno = 2939 (0xb7b), region = 32  ;;  %s1163_s17 = sshll.u32 (!%p2191_p5), %s1818_s1, 5 }
  0x5d   : > { %s232_s24 = scalar_lea.sflag (!%p2191_p5), [#allocation4], %s1818_s1  ;;  %s1822_s25 = scalar_lea.vmem (!%p2191_p5), [#allocation3], %s1163_s17 }
  0x63   : > { %1571 = dma.done.wait (%p2192_p6), %s232_s24, 512  }
  0x64   : > { %1573 = vsyncadd (%p2192_p6), %s232_s24, 4294966784  ;;  %p2193_p9 = scmp.eq.s32.totalorder %s1693_s22, 0 }
  0x66   : > { %1575 = dma.done.wait (%p2193_p9), [#allocation7], 512   ;;  %p2194_p10 = pmov %p2193_p9 }
  0x67   : > { %s266_s20 = sand.u32 1, %s1592_s16   ;;  %s1835_s14 = scalar_lea.vmem [#allocation8], %s1163_s17 }
  0x68   : > { %1577 = vsyncadd (%p2194_p10), [#allocation7], 4294966784  ;;  %s1166_s28 = sshll.u32 %s266_s20, 5  ;;  %p2195_p2 = scmp.ne.s32.totalorder %s1693_s22, 0 }
  0x69   : > { %s1837_s27 = scalar_lea.vmem [#allocation9], %s1166_s28  ;;  %vm278_vm0 = vcmask (!%p2195_p2), 261120   ;;  %v1622_v0 = vmov (!%p2195_p2), 0.0  }
  0x6a   : > { %277 = sbr.rel (%p2195_p2) target bundleno = 113 (0x71), region = 44  ;;  %279 = vst.msk [vmem:[#allocation2] sm:$0xff] (!%p2195_p2), %vm278_vm0, %v1622_v0  ;;  %280 = vst.msk [vmem:[#allocation2 + $0x8] sm:$0xff] (!%p2195_p2), %vm278_vm0, %v1622_v0 }
  0x71 PF: > { %v1841_v1 = vld [vmem:[#allocation6] sm:$0xff]   ;;  %v1623_v2 = vmov 0.0   ;;  %v1845_v3 = vld [vmem:[#allocation6 + $0x10] sm:$0xff]   ;;  %v1848_v4 = vld [vmem:[#allocation6 + $0x8] sm:$0xff]   ;;  %vm1624_vm1 = vmmov 0   ;;  %s1625_s5 = smov 64  }
  0x72   : > { %1239 = vmatprep.subr.bf16.mxu0 %v1623_v2  ;;  %1247 = vmatprep.subr.bf16.mxu1 %v1623_v2  ;;  %v1854_v5 = vld [vmem:[#allocation6 + $0x18] sm:$0xff]   ;;  %v1857_v6 = vld [vmem:[#allocation2] sm:$0xff]  ;;  %vm310_vm2 = vcmask 261120   ;;  %v1902_v24 = vld [vmem:[%s1822_s25] sm:$0xff]   ;;  %s1626_s26 = smov 32   ;;  %s1627_s11 = smov 96  }
  0x73   : > { %1240 = vmatpush3.bf16.msra.mxu0 %v1841_v1  ;;  %1243 = vmatprep.mubr.msk.bf16.mxu0 %vm1624_vm1, %v1623_v2  ;;  %v1861_v7 = vld [vmem:[#allocation2 + $0x8] sm:$0xff]  ;;  %v1173_v8 = vld [vmem:[%s2160_s2] ss:$0 sm:$0xff]  ;;  %v297_v9 = vpack.c.bf16 %v1857_v6, %v1857_v6  ;;  %v1179_v11 = vld [vmem:[%s2160_s2 + $0x1] ss:$0 sm:$0xff]  ;;  %v354_v25 = vunpack.c.l.bf16 %v1902_v24  ;;  %s1213_s6 = sshll.u32 %s1693_s22, 9 }
  0x74   : > { %1248 = vmatpush3.bf16.msra.mxu1 %v1845_v3  ;;  %1241 = vmatprep.subr.bf16.mxu0 %v1623_v2  ;;  %v396_v10 = vpack.c.bf16 %v1861_v7, %v1861_v7  ;;  %v1906_v26 = vld [vmem:[%s1822_s25 + $0x10] sm:$0xff]   ;;  %s1021_s23 = sshll.u32 %s1835_s14, 4  ;;  %s1031_s17 = ssub.s32 1, %s1693_s22  ;;  %s2049_s23 = int_to_ptr.vmem [resolvable:$true] %s1021_s23 }
  0x75   : > { %1249 = vmatprep.subr.bf16.mxu1 %v1623_v2  ;;  %1251 = vmatprep.mubr.msk.bf16.mxu1 %vm1624_vm1, %v1623_v2  ;;  %v452_v28 = vunpack.c.l.bf16 %v1906_v26  ;;  %s2047_s28 = scalar_lea.hbm %s2161_s3, %s1213_s6  ;;  %s2051_s29 = sshll.u32 %s1031_s17, 9 }
  0x76   : > { %367 = vrot.lane.b32.xlu0 %v1173_v8, %s1625_s5  ;;  %s1038_s30 = sshll.u32 %s1837_s27, 4  ;;  %s1486_s22 = scalar_lea.vmem %s2049_s23, 512  ;;  %s2092_s30 = int_to_ptr.vmem [resolvable:$true] %s1038_s30 }
  0x77   : > { %1242 = vmatpush3.bf16.msra.mxu0 %v1848_v4  ;;  %p1487_p0 = scmp.ne.s32.totalorder %s2049_s23, %s1486_s22  ;;  %p2196_p12 = scmp.ne.s32.totalorder %s2181_s7, 0 }
  0x78   : > { %1250 = vmatpush3.bf16.msra.mxu1 %v1854_v5  ;;  %1255 = vmatprep.subr.bf16.mxu0 %v1623_v2  ;;  %s1628_s9 = smov [#allocation8]  }
  0x79   : > { %1263 = vmatprep.subr.bf16.mxu1 %v1623_v2  ;;  %p1488_p13 = pnand %p1487_p0, %p2196_p12  ;;  %s1490_s10 = sshll.u32 %s1628_s9, 4  ;;  %s1491_s10 = int_to_ptr.vmem [resolvable:$false] %s1490_s10 }
  0x7a   : > { %1244 = vmatmul.mubr.msk.bf16.vlgmr.msra.gmra.mrb[0].mxu0 %vm310_vm2, %v297_v9  ;;  %465 = vrot.lane.b32.xlu0 %v1179_v11, %s1625_s5  ;;  %p1493_p3 = scmp.lt.s32.totalorder %s2049_s23, %s1491_s10 }
  0x7b   : > { %1252 = vmatmul.mubr.msk.bf16.vlgmr.msra.gmra.mrb[0].mxu1 %vm310_vm2, %v396_v10  ;;  %1256 = vmatpush3.bf16.msra.mxu0 %v1841_v1  ;;  %p1489_p1 = pneg %p1488_p13 }
  0x7c   : > { %1257 = vmatprep.subr.bf16.mxu0 %v1623_v2  ;;  %1264 = vmatpush3.bf16.msra.mxu1 %v1845_v3 }
  0x7d   : > { %1259 = vmatprep.mubr.msk.bf16.mxu0 %vm1624_vm1, %v1623_v2  ;;  %1265 = vmatprep.subr.bf16.mxu1 %v1623_v2 }
  0x7e   : > { %1267 = vmatprep.mubr.msk.bf16.mxu1 %vm1624_vm1, %v1623_v2 }
  0x7f   : > { %1258 = vmatpush3.bf16.msra.mxu0 %v1848_v4 }
  0x80   : > { %1266 = vmatpush3.bf16.msra.mxu1 %v1854_v5  ;;  %1271 = vmatprep.subr.bf16.mxu0 %v1623_v2 }
  0x81   : > { %1279 = vmatprep.subr.bf16.mxu1 %v1623_v2 }
  0xe8   : > { %v1893_v12 = vpop.permute.xlu0 %367 }
  0xec   : > { %v1895_v14 = vpop.permute.xlu0 %465 }
 0x14d   : > { %v348_v13 = vpop.f32.mrb[0].mxu0 }
 0x14e   : > { %v1245_v15 = vpop.f32.mrb[1].mxu0  ;;  %v446_v16 = vpop.f32.mrb[0].mxu1  ;;  %v370_v17 = vadd.f32 %v1893_v12, %v348_v13  ;;  %v355_v27 = vadd.f32 %v354_v25, %v348_v13 }
 0x14f   : > { %v351_v18 = vpop.f32.mrb[2].mxu0  ;;  %v1253_v19 = vpop.f32.mrb[1].mxu1  ;;  %v468_v22 = vadd.f32 %v1895_v14, %v446_v16  ;;  %v453_v30 = vadd.f32 %v452_v28, %v446_v16 }
 0x150   : > { %v449_v20 = vpop.f32.mrb[2].mxu1  ;;  %372 = vrot.lane.b32.xlu1 %v370_v17, %s1625_s5  ;;  %v1246_v21 = vpop.f32.mrb[3].mxu0  ;;  %v1172_v29 = vmul.f32 -1.442695, %v355_v27  ;;  %v552_v17 = vunpack.c.h.bf16 %v1902_v24  ;;  %v629_v19 = vunpack.c.h.bf16 %v1906_v26 }
 0x151   : > { %v1254_v23 = vpop.f32.mrb[3].mxu1  ;;  %v1178_v31 = vmul.f32 -1.442695, %v453_v30 }
 0x152   : > { %1410 = vpow2.f32 %v1172_v29 }
 0x153   : > { %1412 = vpow2.f32 %v1178_v31 }
 0x154   : > { %470 = vrot.lane.b32.xlu1 %v468_v22, %s1625_s5 }
 0x15c   : > { %v1411_v32 = vpop.eup %1410 }
 0x15d   : > { %v359_v33 = vadd.f32 1.0, %v1411_v32  ;;  %v1413_v34 = vpop.eup %1412 }
 0x15e   : > { %v457_v35 = vadd.f32 1.0, %v1413_v34 }
 0x15f   : > { %1414 = vrcp.f32 %v359_v33 }
 0x160   : > { %1416 = vrcp.f32 %v457_v35 }
 0x169   : > { %v1415_v36 = vpop.eup %1414 }
 0x16a   : > { %v1417_v39 = vpop.eup %1416  ;;  %v382_v49 = vsub.f32 1.0, %v1415_v36 }
 0x16b   : > { %v480_v55 = vsub.f32 1.0, %v1417_v39 }
 0x1c2   : > { %v373_v37 = vpop.permute.xlu1 %372 }
 0x1c3   : > { %v375_v38 = vmul.f32 %v1415_v36, %v373_v37 }
 0x1c5   : > { %377 = vrot.lane.b32.xlu0 %v375_v38, %s1625_s5 }
 0x1c6   : > { %v471_v40 = vpop.permute.xlu1 %470 }
 0x1c7   : > { %v473_v41 = vmul.f32 %v1417_v39, %v471_v40 }
 0x1c9   : > { %475 = vrot.lane.b32.xlu1 %v473_v41, %s1625_s5 }
 0x1cd   : > { %389 = vrot.lane.b32.xlu1 %v1857_v6, %s1626_s26 }
 0x1d1   : > { %487 = vrot.lane.b32.xlu1 %v1861_v7, %s1626_s26  ;;  %s1492_s26 = scalar_lea.vmem %s1491_s10, 1024 }
 0x1d2   : > { %p1494_p11 = scmp.lt.s32.totalorder %s1492_s26, %s1486_s22 }
 0x1d4   : > { %p1495_p7 = por %p1494_p11, %p1493_p3 }
 0x1d6   : > { %p1496_p4 = pnand %p1495_p7, %p1489_p1 }
 0x237   : > { %v378_v42 = vpop.permute.xlu0 %377 }
 0x238   : > { %v380_v43 = vadd.f32 %v378_v42, %v354_v25 }
 0x23a   : > { %1418 = vtanh.f32 %v380_v43 }
 0x23b   : > { %v476_v44 = vpop.permute.xlu1 %475 }
 0x23c   : > { %v478_v45 = vadd.f32 %v476_v44, %v452_v28 }
 0x23e   : > { %1420 = vtanh.f32 %v478_v45 }
 0x23f   : > { %v390_v48 = vpop.permute.xlu1 %389 }
 0x240   : > { %v392_v51 = vmul.f32 %v1415_v36, %v390_v48 }
 0x243   : > { %v488_v53 = vpop.permute.xlu1 %487 }
 0x244   : > { %v1419_v46 = vpop.eup %1418  ;;  %v490_v57 = vmul.f32 %v1417_v39, %v488_v53 }
 0x245   : > { %384 = vrot.lane.b32.xlu0 %v1419_v46, %s1627_s11 }
 0x248   : > { %v1421_v47 = vpop.eup %1420 }
 0x249   : > { %482 = vrot.lane.b32.xlu0 %v1421_v47, %s1627_s11 }
 0x2b7   : > { %v385_v50 = vpop.permute.xlu0 %384 }
 0x2b8   : > { %v387_v52 = vmul.f32 %v385_v50, %v382_v49 }
 0x2ba   : > { %v1915_v54 = vadd.f32 %v392_v51, %v387_v52 }
 0x2bb   : > { %v483_v56 = vpop.permute.xlu0 %482 }
 0x2bc   : > { %v485_v58 = vmul.f32 %v483_v56, %v480_v55  ;;  %v505_v59 = vpack.c.bf16 %v1915_v54, %v1915_v54 }
 0x2be   : > { %v1919_v60 = vadd.f32 %v490_v57, %v485_v58  ;;  %507 = vrot.lane.b32.xlu0 %v505_v59, %s1627_s11 }
 0x2c0   : > { %v582_v61 = vpack.c.bf16 %v1919_v60, %v1919_v60 }
 0x2c2   : > { %584 = vrot.lane.b32.xlu1 %v582_v61, %s1627_s11 }
 0x330   : > { %v508_v62 = vpop.permute.xlu0 %507 }
 0x331   : > { %1260 = vmatmul.mubr.msk.bf16.vlgmr.msra.gmra.mrb[4].mxu0 %vm310_vm2, %v508_v62  ;;  %v1982_v62 = vld [vmem:[%s1822_s25 + $0x18] sm:$0xff]  }
 0x332   : > { %1272 = vmatpush3.bf16.msra.mxu0 %v1841_v1  ;;  %1275 = vmatprep.mubr.msk.bf16.mxu0 %vm1624_vm1, %v1623_v2 }
 0x333   : > { %1273 = vmatprep.subr.bf16.mxu0 %v1623_v2 }
 0x334   : > { %v585_v63 = vpop.permute.xlu1 %584 }
 0x335   : > { %1268 = vmatmul.mubr.msk.bf16.vlgmr.msra.gmra.mrb[4].mxu1 %vm310_vm2, %v585_v63 }
 0x336   : > { %1280 = vmatpush3.bf16.msra.mxu1 %v1845_v3  ;;  %1274 = vmatpush3.bf16.msra.mxu0 %v1848_v4 }
 0x337   : > { %1281 = vmatprep.subr.bf16.mxu1 %v1623_v2  ;;  %1283 = vmatprep.mubr.msk.bf16.mxu1 %vm1624_vm1, %v1623_v2 }
 0x338   : > { %1287 = vmatprep.subr.bf16.mxu0 %v1623_v2 }
 0x33a   : > { %1282 = vmatpush3.bf16.msra.mxu1 %v1854_v5 }
 0x33b   : > { %1295 = vmatprep.subr.bf16.mxu1 %v1623_v2 }
 0x404   : > { %v546_v0 = vpop.f32.mrb[4].mxu0 }
 0x405   : > { %v560_v6 = vadd.f32 %v546_v0, %v1893_v12  ;;  %v1261_v7 = vpop.f32.mrb[5].mxu0  ;;  %v553_v18 = vadd.f32 %v552_v17, %v546_v0  ;;  %v795_v0 = vunpack.c.l.bf16 %v1982_v62 }
 0x406   : > { %v549_v8 = vpop.f32.mrb[6].mxu0 }
 0x407   : > { %562 = vrot.lane.b32.xlu0 %v560_v6, %s1625_s5  ;;  %v1262_v9 = vpop.f32.mrb[7].mxu0  ;;  %v1183_v20 = vmul.f32 -1.442695, %v553_v18 }
 0x408   : > { %v623_v10 = vpop.f32.mrb[4].mxu1 }
 0x409   : > { %v637_v11 = vadd.f32 %v623_v10, %v1895_v14  ;;  %v1269_v13 = vpop.f32.mrb[5].mxu1  ;;  %v630_v21 = vadd.f32 %v629_v19, %v623_v10  ;;  %1422 = vpow2.f32 %v1183_v20 }
 0x40a   : > { %v626_v15 = vpop.f32.mrb[6].mxu1 }
 0x40b   : > { %639 = vrot.lane.b32.xlu1 %v637_v11, %s1625_s5  ;;  %v1270_v16 = vpop.f32.mrb[7].mxu1  ;;  %v1186_v22 = vmul.f32 -1.442695, %v630_v21 }
 0x40d   : > { %1424 = vpow2.f32 %v1186_v22 }
 0x413   : > { %v1423_v23 = vpop.eup %1422 }
 0x414   : > { %v557_v25 = vadd.f32 1.0, %v1423_v23 }
 0x416   : > { %1426 = vrcp.f32 %v557_v25 }
 0x417   : > { %v1425_v27 = vpop.eup %1424 }
 0x418   : > { %v634_v28 = vadd.f32 1.0, %v1425_v27 }
 0x41a   : > { %1428 = vrcp.f32 %v634_v28 }
 0x420   : > { %v1427_v29 = vpop.eup %1426 }
 0x421   : > { %v572_v39 = vsub.f32 1.0, %v1427_v29  ;;  %v578_v41 = vmul.f32 %v1427_v29, %v1915_v54 }
 0x424   : > { %v1429_v24 = vpop.eup %1428 }
 0x425   : > { %v649_v44 = vsub.f32 1.0, %v1429_v24  ;;  %v655_v46 = vmul.f32 %v1429_v24, %v1919_v60 }
 0x479   : > { %v563_v30 = vpop.permute.xlu0 %562 }
 0x47a   : > { %v565_v31 = vmul.f32 %v1427_v29, %v563_v30 }
 0x47c   : > { %567 = vrot.lane.b32.xlu0 %v565_v31, %s1625_s5 }
 0x47d   : > { %v640_v32 = vpop.permute.xlu1 %639 }
 0x47e   : > { %v642_v33 = vmul.f32 %v1429_v24, %v640_v32 }
 0x480   : > { %644 = vrot.lane.b32.xlu1 %v642_v33, %s1625_s5 }
 0x4ee   : > { %v568_v26 = vpop.permute.xlu0 %567 }
 0x4ef   : > { %v570_v34 = vadd.f32 %v568_v26, %v552_v17 }
 0x4f1   : > { %1430 = vtanh.f32 %v570_v34 }
 0x4f2   : > { %v645_v35 = vpop.permute.xlu1 %644 }
 0x4f3   : > { %v647_v36 = vadd.f32 %v645_v35, %v629_v19 }
 0x4f5   : > { %1432 = vtanh.f32 %v647_v36 }
 0x4fb   : > { %v1431_v37 = vpop.eup %1430 }
 0x4fc   : > { %574 = vrot.lane.b32.xlu0 %v1431_v37, %s1627_s11 }
 0x4ff   : > { %v1433_v38 = vpop.eup %1432 }
 0x500   : > { %651 = vrot.lane.b32.xlu1 %v1433_v38, %s1627_s11 }
 0x56e   : > { %v575_v40 = vpop.permute.xlu0 %574 }
 0x56f   : > { %v577_v42 = vmul.f32 %v575_v40, %v572_v39 }
 0x571   : > { %v1950_v43 = vadd.f32 %v578_v41, %v577_v42 }
 0x572   : > { %v652_v45 = vpop.permute.xlu1 %651 }
 0x573   : > { %v654_v47 = vmul.f32 %v652_v45, %v649_v44  ;;  %v671_v48 = vpack.c.bf16 %v1950_v43, %v1950_v43 }
 0x575   : > { %v1955_v49 = vadd.f32 %v655_v46, %v654_v47  ;;  %673 = vrot.lane.b32.xlu0 %v671_v48, %s1627_s11 }
 0x577   : > { %v748_v50 = vpack.c.bf16 %v1955_v49, %v1955_v49 }
 0x579   : > { %750 = vrot.lane.b32.xlu1 %v748_v50, %s1627_s11 }
 0x5e7   : > { %v674_v51 = vpop.permute.xlu0 %673 }
 0x5e8   : > { %1276 = vmatmul.mubr.msk.bf16.vlgmr.msra.gmra.mrb[8].mxu0 %vm310_vm2, %v674_v51 }
 0x5e9   : > { %1288 = vmatpush3.bf16.msra.mxu0 %v1841_v1  ;;  %1291 = vmatprep.mubr.msk.bf16.mxu0 %vm1624_vm1, %v1623_v2 }
 0x5ea   : > { %1289 = vmatprep.subr.bf16.mxu0 %v1623_v2 }
 0x5eb   : > { %v751_v52 = vpop.permute.xlu1 %750 }
 0x5ec   : > { %1284 = vmatmul.mubr.msk.bf16.vlgmr.msra.gmra.mrb[8].mxu1 %vm310_vm2, %v751_v52 }
 0x5ed   : > { %1296 = vmatpush3.bf16.msra.mxu1 %v1845_v3  ;;  %1290 = vmatpush3.bf16.msra.mxu0 %v1848_v4 }
 0x5ee   : > { %1297 = vmatprep.subr.bf16.mxu1 %v1623_v2  ;;  %1299 = vmatprep.mubr.msk.bf16.mxu1 %vm1624_vm1, %v1623_v2  ;;  %v1978_v2 = vld [vmem:[%s1822_s25 + $0x8] sm:$0xff]  }
 0x5f1   : > { %1298 = vmatpush3.bf16.msra.mxu1 %v1854_v5  ;;  %v718_v5 = vunpack.c.l.bf16 %v1978_v2 }
 0x6bb   : > { %v712_v1 = vpop.f32.mrb[8].mxu0 }
 0x6bc   : > { %v726_v53 = vadd.f32 %v712_v1, %v1893_v12  ;;  %v1277_v55 = vpop.f32.mrb[9].mxu0  ;;  %v719_v63 = vadd.f32 %v718_v5, %v712_v1  ;;  %v884_v1 = vunpack.c.h.bf16 %v1978_v2 }
 0x6bd   : > { %v715_v56 = vpop.f32.mrb[10].mxu0  ;;  %v961_v55 = vunpack.c.h.bf16 %v1982_v62 }
 0x6be   : > { %728 = vrot.lane.b32.xlu0 %v726_v53, %s1625_s5  ;;  %v1278_v57 = vpop.f32.mrb[11].mxu0  ;;  %v1191_v6 = vmul.f32 -1.442695, %v719_v63 }
 0x6bf   : > { %v789_v3 = vpop.f32.mrb[8].mxu1 }
 0x6c0   : > { %v803_v4 = vadd.f32 %v789_v3, %v1895_v14  ;;  %v1285_v58 = vpop.f32.mrb[9].mxu1  ;;  %v796_v7 = vadd.f32 %v795_v0, %v789_v3  ;;  %1434 = vpow2.f32 %v1191_v6 }
 0x6c1   : > { %v792_v59 = vpop.f32.mrb[10].mxu1 }
 0x6c2   : > { %805 = vrot.lane.b32.xlu1 %v803_v4, %s1625_s5  ;;  %v1286_v61 = vpop.f32.mrb[11].mxu1  ;;  %v1194_v8 = vmul.f32 -1.442695, %v796_v7 }
 0x6c4   : > { %1436 = vpow2.f32 %v1194_v8 }
 0x6ca   : > { %v1435_v9 = vpop.eup %1434 }
 0x6cb   : > { %v723_v10 = vadd.f32 1.0, %v1435_v9 }
 0x6cd   : > { %1438 = vrcp.f32 %v723_v10 }
 0x6ce   : > { %v1437_v11 = vpop.eup %1436 }
 0x6cf   : > { %v800_v13 = vadd.f32 1.0, %v1437_v11 }
 0x6d1   : > { %1440 = vrcp.f32 %v800_v13 }
 0x6d7   : > { %v1439_v15 = vpop.eup %1438 }
 0x6d8   : > { %v738_v29 = vsub.f32 1.0, %v1439_v15  ;;  %v744_v31 = vmul.f32 %v1439_v15, %v1950_v43 }
 0x6db   : > { %v1441_v18 = vpop.eup %1440 }
 0x6dc   : > { %v815_v33 = vsub.f32 1.0, %v1441_v18  ;;  %v821_v34 = vmul.f32 %v1441_v18, %v1955_v49 }
 0x730   : > { %v729_v16 = vpop.permute.xlu0 %728 }
 0x731   : > { %v731_v17 = vmul.f32 %v1439_v15, %v729_v16 }
 0x733   : > { %733 = vrot.lane.b32.xlu0 %v731_v17, %s1625_s5 }
 0x734   : > { %v806_v19 = vpop.permute.xlu1 %805 }
 0x735   : > { %v808_v20 = vmul.f32 %v1441_v18, %v806_v19 }
 0x737   : > { %810 = vrot.lane.b32.xlu1 %v808_v20, %s1625_s5 }
 0x7a5   : > { %v734_v21 = vpop.permute.xlu0 %733 }
 0x7a6   : > { %v736_v22 = vadd.f32 %v734_v21, %v718_v5 }
 0x7a8   : > { %1442 = vtanh.f32 %v736_v22 }
 0x7a9   : > { %v811_v23 = vpop.permute.xlu1 %810 }
 0x7aa   : > { %v813_v25 = vadd.f32 %v811_v23, %v795_v0 }
 0x7ac   : > { %1444 = vtanh.f32 %v813_v25 }
 0x7b2   : > { %v1443_v27 = vpop.eup %1442 }
 0x7b3   : > { %740 = vrot.lane.b32.xlu0 %v1443_v27, %s1627_s11 }
 0x7b6   : > { %v1445_v28 = vpop.eup %1444 }
 0x7b7   : > { %817 = vrot.lane.b32.xlu1 %v1445_v28, %s1627_s11 }
 0x825   : > { %v741_v30 = vpop.permute.xlu0 %740 }
 0x826   : > { %v743_v24 = vmul.f32 %v741_v30, %v738_v29 }
 0x828   : > { %v1990_v32 = vadd.f32 %v744_v31, %v743_v24 }
 0x829   : > { %v818_v26 = vpop.permute.xlu1 %817 }
 0x82a   : > { %v820_v35 = vmul.f32 %v818_v26, %v815_v33  ;;  %v837_v36 = vpack.c.bf16 %v1990_v32, %v1990_v32 }
 0x82c   : > { %v1995_v37 = vadd.f32 %v821_v34, %v820_v35  ;;  %839 = vrot.lane.b32.xlu0 %v837_v36, %s1627_s11 }
 0x82e   : > { %v914_v38 = vpack.c.bf16 %v1995_v37, %v1995_v37 }
 0x830   : > { %916 = vrot.lane.b32.xlu1 %v914_v38, %s1627_s11 }
 0x89e   : > { %v840_v39 = vpop.permute.xlu0 %839 }
 0x89f   : > { %1292 = vmatmul.mubr.msk.bf16.vlgmr.msra.gmra.mrb[12].mxu0 %vm310_vm2, %v840_v39 }
 0x8a2   : > { %v917_v40 = vpop.permute.xlu1 %916 }
 0x8a3   : > { %1300 = vmatmul.mubr.msk.bf16.vlgmr.msra.gmra.mrb[12].mxu1 %vm310_vm2, %v917_v40 }
 0x972   : > { %v878_v41 = vpop.f32.mrb[12].mxu0 }
 0x973   : > { %v892_v42 = vadd.f32 %v878_v41, %v1893_v12  ;;  %v1293_v44 = vpop.f32.mrb[13].mxu0  ;;  %v885_v53 = vadd.f32 %v884_v1, %v878_v41 }
 0x974   : > { %v881_v45 = vpop.f32.mrb[14].mxu0 }
 0x975   : > { %894 = vrot.lane.b32.xlu0 %v892_v42, %s1625_s5  ;;  %v1294_v46 = vpop.f32.mrb[15].mxu0  ;;  %v1199_v56 = vmul.f32 -1.442695, %v885_v53 }
 0x976   : > { %v955_v47 = vpop.f32.mrb[12].mxu1 }
 0x977   : > { %v969_v48 = vadd.f32 %v955_v47, %v1895_v14  ;;  %v1301_v50 = vpop.f32.mrb[13].mxu1  ;;  %v962_v12 = vadd.f32 %v961_v55, %v955_v47  ;;  %1446 = vpow2.f32 %v1199_v56 }
 0x978   : > { %v958_v51 = vpop.f32.mrb[14].mxu1 }
 0x979   : > { %971 = vrot.lane.b32.xlu1 %v969_v48, %s1625_s5  ;;  %v1302_v52 = vpop.f32.mrb[15].mxu1  ;;  %v1202_v57 = vmul.f32 -1.442695, %v962_v12 }
 0x97b   : > { %1448 = vpow2.f32 %v1202_v57 }
 0x981   : > { %v1447_v3 = vpop.eup %1446 }
 0x982   : > { %v889_v4 = vadd.f32 1.0, %v1447_v3 }
 0x984   : > { %1450 = vrcp.f32 %v889_v4 }
 0x985   : > { %v1449_v58 = vpop.eup %1448 }
 0x986   : > { %v966_v14 = vadd.f32 1.0, %v1449_v58 }
 0x988   : > { %1452 = vrcp.f32 %v966_v14 }
 0x98e   : > { %v1451_v59 = vpop.eup %1450 }
 0x98f   : > { %v904_v11 = vsub.f32 1.0, %v1451_v59  ;;  %v910_v13 = vmul.f32 %v1451_v59, %v1990_v32 }
 0x992   : > { %v1453_v2 = vpop.eup %1452 }
 0x993   : > { %v981_v16 = vsub.f32 1.0, %v1453_v2 }
 0x9e7   : > { %v895_v61 = vpop.permute.xlu0 %894 }
 0x9e8   : > { %v897_v5 = vmul.f32 %v1451_v59, %v895_v61 }
 0x9ea   : > { %899 = vrot.lane.b32.xlu0 %v897_v5, %s1625_s5 }
 0x9eb   : > { %v972_v63 = vpop.permute.xlu1 %971 }
 0x9ec   : > { %v974_v0 = vmul.f32 %v1453_v2, %v972_v63 }
 0x9ee   : > { %976 = vrot.lane.b32.xlu1 %v974_v0, %s1625_s5  ;;  %s1003_s5 = scalar_lea.sflag [#allocation5], %s1818_s1 }
 0xa5c   : > { %v900_v62 = vpop.permute.xlu0 %899 }
 0xa5d   : > { %v902_v6 = vadd.f32 %v900_v62, %v884_v1 }
 0xa5f   : > { %1454 = vtanh.f32 %v902_v6 }
 0xa60   : > { %v977_v7 = vpop.permute.xlu1 %976 }
 0xa61   : > { %v979_v8 = vadd.f32 %v977_v7, %v961_v55 }
 0xa63   : > { %1456 = vtanh.f32 %v979_v8 }
 0xa69   : > { %v1455_v9 = vpop.eup %1454 }
 0xa6a   : > { %906 = vrot.lane.b32.xlu0 %v1455_v9, %s1627_s11 }
 0xa6d   : > { %v1457_v10 = vpop.eup %1456 }
 0xa6e   : > { %983 = vrot.lane.b32.xlu1 %v1457_v10, %s1627_s11  ;;  %493 = vrot.lane.b32.xlu0 %v1915_v54, %s1627_s11 }
 0xa72   : > { %498 = vrot.lane.b32.xlu1 %v1919_v60, %s1627_s11  ;;  %658 = vrot.lane.b32.xlu0 %v1950_v43, %s1627_s11 }
 0xa76   : > { %664 = vrot.lane.b32.xlu1 %v1955_v49, %s1627_s11  ;;  %824 = vrot.lane.b32.xlu0 %v1990_v32, %s1627_s11  ;;  %v987_v49 = vmul.f32 %v1453_v2, %v1995_v37 }
 0xa7a   : > { %830 = vrot.lane.b32.xlu1 %v1995_v37, %s1627_s11 }
 0xadc   : > { %v907_v54 = vpop.permute.xlu0 %906 }
 0xadd   : > { %v909_v15 = vmul.f32 %v907_v54, %v904_v11 }
 0xadf   : > { %v911_v60 = vadd.f32 %v910_v13, %v909_v15 }
 0xae0   : > { %v984_v43 = vpop.permute.xlu1 %983  ;;  %v494_v17 = vpop.permute.xlu0 %493 }
 0xae1   : > { %v986_v18 = vmul.f32 %v984_v43, %v981_v16  ;;  %496 = vst.msk [vmem:[%s1835_s14] sm:$0xff] %vm310_vm2, %v494_v17  ;;  %990 = vrot.lane.b32.xlu0 %v911_v60, %s1627_s11 }
 0xae3   : > { %v988_v19 = vadd.f32 %v987_v49, %v986_v18 }
 0xae4   : > { %v499_v20 = vpop.permute.xlu1 %498  ;;  %v659_v21 = vpop.permute.xlu0 %658 }
 0xae5   : > { %1180 = vst.msk [vmem:[%s1837_s27 + $0x18] sm:$0xff] %vm310_vm2, %v499_v20  ;;  %1187 = vst.msk [vmem:[%s1835_s14 + $0x8] sm:$0xff] %vm310_vm2, %v659_v21  ;;  %996 = vrot.lane.b32.xlu1 %v988_v19, %s1627_s11 }
 0xae8   : > { %v665_v22 = vpop.permute.xlu1 %664  ;;  %v825_v23 = vpop.permute.xlu0 %824 }
 0xae9   : > { %1188 = vst.msk [vmem:[%s1837_s27 + $0x10] sm:$0xff] %vm310_vm2, %v665_v22  ;;  %1195 = vst.msk [vmem:[%s1835_s14 + $0x10] sm:$0xff] %vm310_vm2, %v825_v23 }
 0xaec   : > { %v831_v25 = vpop.permute.xlu1 %830 }
 0xaed   : > { %1196 = vst.msk [vmem:[%s1837_s27 + $0x8] sm:$0xff] %vm310_vm2, %v831_v25 }
 0xb53   : > { %v991_v27 = vpop.permute.xlu0 %990 }
 0xb54   : > { %1203 = vst.msk [vmem:[%s1835_s14 + $0x18] sm:$0xff] %vm310_vm2, %v991_v27  ;;  %1000 = vst.msk [vmem:[#allocation2] sm:$0xff] %vm310_vm2, %v991_v27 }
 0xb55   : > { %1499 = shalt.err (!%p1496_p4)
}
 0xb56   : > { %s1500_s14 = scalar_lea.hbm %s2047_s28, 512  ;;  %s1504_s17 = scalar_lea.hbm %s2161_s3, 1024 }
 0xb57   : > { %p1501_p5 = scmp.ne.s32.totalorder %s2047_s28, %s1500_s14  ;;  %p1505_p10 = scmp.lt.u32.totalorder %s2047_s28, %s2161_s3 }
 0xb58   : > { %p1506_p2 = scmp.lt.u32.totalorder %s1504_s17, %s1500_s14  ;;  %p1508_p13 = scmp.lt.u32.totalorder %s1500_s14, %s2047_s28 }
 0xb59   : > { %p1502_p6 = pnand %p1501_p5, %p2196_p12 }
 0xb5a   : > { %p1507_p0 = por %p1506_p2, %p1505_p10 }
 0xb5b   : > { %p1503_p9 = pneg %p1502_p6 }
 0xb5c   : > { %p1509_p1 = por %p1508_p13, %p1507_p0 }
 0xb5e   : > { %p1510_p3 = pnand %p1509_p1, %p1503_p9 }
 0xb60   : > { %1513 = shalt.err (!%p1510_p3)
}
 0xb61   : > { %s1629_s22 = smov 128   ;;  %s1630_s9 = smov 8   ;;  %v997_v28 = vpop.permute.xlu1 %996 }
 0xb62   : > { %1316 = dma.vmem_to_hbm [thread:$0]  (%p2196_p12), %s2049_s23, 512, %s2047_s28, %s1003_s5, %s1629_s22, %s1629_s22, %s1630_s9   ;;  %1001 = vst.msk [vmem:[#allocation2 + $0x8] sm:$0xff] %vm310_vm2, %v997_v28 }
 0xb63   : > { %s2088_s14 = scalar_lea.hbm %s2162_s4, %s2051_s29  ;;  %999 = vst.msk [vmem:[%s1837_s27] sm:$0xff] %vm310_vm2, %v997_v28  ;;  %s2099_s7 = scalar_lea.sflag [#allocation10], %s266_s20 }
 0xb64   : > { %s1514_s1 = scalar_lea.vmem %s2092_s30, 512  ;;  %p2197_p11 = scmp.ne.s32.totalorder %s2184_s12, 0 }
 0xb65   : > { %p1515_p12 = scmp.ne.s32.totalorder %s2092_s30, %s1514_s1  ;;  %s1631_s23 = smov [#allocation9]  }
 0xb66   : > { %s1518_s28 = sshll.u32 %s1631_s23, 4  ;;  %s1519_s28 = int_to_ptr.vmem [resolvable:$false] %s1518_s28 }
 0xb67   : > { %p1516_p7 = pnand %p1515_p12, %p2197_p11  ;;  %s1520_s29 = scalar_lea.vmem %s1519_s28, 1024 }
 0xb68   : > { %p1521_p5 = scmp.lt.s32.totalorder %s2092_s30, %s1519_s28  ;;  %p1522_p6 = scmp.lt.s32.totalorder %s1520_s29, %s1514_s1 }
 0xb69   : > { %p1517_p4 = pneg %p1516_p7 }
 0xb6a   : > { %p1523_p9 = por %p1522_p6, %p1521_p5 }
 0xb6c   : > { %p1524_p10 = pnand %p1523_p9, %p1517_p4 }
 0xb6e   : > { %1527 = shalt.err (!%p1524_p10)
}
 0xb6f   : > { %s1528_s20 = scalar_lea.hbm %s2088_s14, 512  ;;  %s1532_s11 = scalar_lea.hbm %s2162_s4, 1024 }
 0xb70   : > { %p1529_p2 = scmp.ne.s32.totalorder %s2088_s14, %s1528_s20  ;;  %p1533_p1 = scmp.lt.u32.totalorder %s2088_s14, %s2162_s4 }
 0xb71   : > { %p1534_p3 = scmp.lt.u32.totalorder %s1532_s11, %s1528_s20  ;;  %p1536_p7 = scmp.lt.u32.totalorder %s1528_s20, %s2088_s14 }
 0xb72   : > { %p1530_p0 = pnand %p1529_p2, %p2197_p11 }
 0xb73   : > { %p1535_p12 = por %p1534_p3, %p1533_p1 }
 0xb74   : > { %p1531_p13 = pneg %p1530_p0 }
 0xb75   : > { %p1537_p4 = por %p1536_p7, %p1535_p12 }
 0xb77   : > { %p1538_p5 = pnand %p1537_p4, %p1531_p13 }
 0xb79   : > { %1541 = shalt.err (!%p1538_p5)
}
 0xb7a   : > { %1317 = dma.vmem_to_hbm [thread:$0]  (%p2197_p11), %s2092_s30, 512, %s2088_s14, %s2099_s7, %s1629_s22, %s1629_s22, %s1630_s9  }
 0xb7b PF: > { %s1053_s24 = sand.u32 1, %s1600_s18   ;;  %p2198_p6 = scmp.ne.s32.totalorder %s2182_s8, 0 }
 0xb7c   : > { %s1054_s25 = scalar_lea.sflag [#allocation5], %s1053_s24 }
 0xb7d   : > { %p1325_p9 = pnand %p1156_p8, %p2198_p6 }
 0xb7f   : > { %1579 = dma.done.wait (!%p1325_p9), %s1054_s25, 512  }
 0xb80   : > { %1581 = vsyncadd (!%p1325_p9), %s1054_s25, 4294966784  ;;  %s1062_s12 = sand.u32 1, %s1588_s15   ;;  %p2199_p10 = scmp.ne.s32.totalorder %s2185_s13, 0 }
 0xb81   : > { %s1063_s10 = scalar_lea.sflag [#allocation10], %s1062_s12 }
 0xb82   : > { %p1328_p2 = pnand %p1156_p8, %p2199_p10 }
 0xb84   : > { %1583 = dma.done.wait (!%p1328_p2), %s1063_s10, 512  }
 0xb85   : > { %1585 = vsyncadd (!%p1328_p2), %s1063_s10, 4294966784  ;;  %s2200_s21 = sld [smem:[#allocation20_spill]]  ;;  %s2201_s30 = sld [smem:[#allocation18_spill]] }
 0xb86   : > { %s2202_s17 = sld [smem:[#allocation22_spill]]  ;;  %s2203_s8 = sld [smem:[#allocation19_spill]] }
 0xb87   : > { %s2204_s20 = sld [smem:[#allocation21_spill]]  ;;  %s2205_s15 = smov %s1592_s16 }
 0xb88   : > { %s2207_s18 = smov %s1604_s19 }
 0xb8b   : > { %p22_p11 = scmp.ge.s32.totalorder %s2200_s21, 4   ;;  %s2206_s16 = smov %s2201_s30 }
 0xb8c   : > { %s2208_s19 = smov %s2203_s8 }
 0xb8d   :  { %24 = sbr.rel (!%p22_p11) target bundleno = 12 (0xc), region = 123 }
 0xb94   :  { %1068 = vsyncpa [#allocation4], 1 }
 0xb95   :  { %1070 = vsyncpa [#allocation4 + $0x1], 1 }
 0xb96   :  { %1071 = vsyncpa [#allocation7], 1 }
 0xb97   :  { %1072 = vsyncpa [#allocation5], 1 }
 0xb98   :  { %1074 = vsyncpa [#allocation5 + $0x1], 1 }
 0xb99   :  { %1075 = vsyncpa [#allocation10], 1 }
 0xb9a   :  { %1077 = vsyncpa [#allocation10 + $0x1], 1 }

</bundles_post_ra>
